<compile_context>
chip_gen: v6e
topology: v6e:2x2x1
jax: 0.10.0
libtpu: 0.0.40
codegen_flags: <defaults>
</compile_context>

<pallas_src>
import jax
import jax.numpy as jnp
from jax.experimental import pallas as pl
from jax.experimental.pallas import tpu as pltpu

EPS = 1e-5


def bn_relu_kernel(x_ref, gb_ref, o_ref):
    # x_ref:  (TILE_C, NHW) float32
    # gb_ref: (TILE_C, 2)   float32  -- column 0 = gamma, column 1 = beta
    x = x_ref[...]
    nhw = x.shape[1]
    inv_n = 1.0 / nhw

    # One-pass batch statistics (biased variance, training-mode BatchNorm).
    s1 = jnp.sum(x, axis=1, keepdims=True)        # (TILE_C, 1)
    s2 = jnp.sum(x * x, axis=1, keepdims=True)    # (TILE_C, 1)
    mean = s1 * inv_n
    var = s2 * inv_n - mean * mean

    # rsqrt on the (TILE_C, 1) column only (EUP slot, negligible cost).
    inv_std = jax.lax.rsqrt(var + EPS)

    gamma = gb_ref[:, 0:1]
    beta = gb_ref[:, 1:2]
    scale = gamma * inv_std                       # (TILE_C, 1)
    bias = beta - mean * scale                    # (TILE_C, 1)

    # Single FMA + ReLU per element.
    o_ref[...] = jnp.maximum(x * scale + bias, 0.0)


def _pick_tile_c(C):
    # Largest channel tile giving 2-4 grid steps with a sublane-aligned
    # (multiple of 8) tile; otherwise fall back to a single full block.
    for steps in (4, 3, 2):
        if C % steps == 0 and (C // steps) % 8 == 0:
            return C // steps
    return C


def batchnorm_relu(x_nchw, gamma, beta):
    """x_nchw: (N, C, H, W) float32; gamma, beta: (C,) float32."""
    N, C, H, W = x_nchw.shape
    nhw = N * H * W

    # (N, C, H, W) -> (C, N*H*W).  For N == 1 this is a pure metadata reshape
    # (no HBM round trip).  For N > 1 the transpose materializes an extra HBM
    # pass; acceptable as a fallback but flagged.
    if N == 1:
        x_cm = x_nchw.reshape(C, nhw)
    else:
        # TODO(synk): for N > 1, keep NCHW and add an N grid axis with
        # accumulated s1/s2 to avoid the transpose round trip.
        x_cm = jnp.transpose(x_nchw, (1, 0, 2, 3)).reshape(C, nhw)

    # Pack gamma/beta into one (C, 2) parameter array: one DMA, less padding.
    gb = jnp.stack([gamma, beta], axis=1)  # (C, 2)

    tile_c = _pick_tile_c(C)
    grid = (C // tile_c,)

    out_cm = pl.pallas_call(
        bn_relu_kernel,
        out_shape=jax.ShapeDtypeStruct((C, nhw), jnp.float32),
        grid_spec=pltpu.PrefetchScalarGridSpec(
            num_scalar_prefetch=0,
            grid=grid,
            in_specs=[
                pl.BlockSpec((tile_c, nhw), lambda i: (i, 0)),
                pl.BlockSpec((tile_c, 2), lambda i: (i, 0)),
            ],
            out_specs=pl.BlockSpec((tile_c, nhw), lambda i: (i, 0)),
        ),
        compiler_params=pltpu.CompilerParams(
            # Channel blocks are fully independent -> parallel (2 TCs on v7x).
            dimension_semantics=("parallel",),
        ),
    )(x_cm, gb)

    # (C, N*H*W) -> (N, C, H, W)
    if N == 1:
        return out_cm.reshape(1, C, H, W)
    return jnp.transpose(out_cm.reshape(C, N, H, W), (1, 0, 2, 3))


def reference(x_nchw, gamma, beta, eps=EPS):
    mean = jnp.mean(x_nchw, axis=(0, 2, 3), keepdims=True)
    var = jnp.mean((x_nchw - mean) ** 2, axis=(0, 2, 3), keepdims=True)
    y = (x_nchw - mean) / jnp.sqrt(var + eps)
    y = y * gamma.reshape(1, -1, 1, 1) + beta.reshape(1, -1, 1, 1)
    return jnp.maximum(y, 0.0)


if __name__ == "__main__":
    key = jax.random.PRNGKey(0)
    k_x, k_g, k_b = jax.random.split(key, 3)

    # Shapes consistent with the module: x211 = randn([1, 864, 14, 14])
    N, C, H, W = 1, 864, 14, 14
    x = jax.random.normal(k_x, (N, C, H, W), dtype=jnp.float32)
    gamma = 1.0 + 0.1 * jax.random.normal(k_g, (C,), dtype=jnp.float32)
    beta = 0.1 * jax.random.normal(k_b, (C,), dtype=jnp.float32)

    out = batchnorm_relu(x, gamma, beta)
    out = jax.block_until_ready(out)

    ref = reference(x, gamma, beta)
    assert out.shape == (N, C, H, W)
    assert jnp.allclose(out, ref, atol=1e-4, rtol=1e-4), (
        float(jnp.max(jnp.abs(out - ref)))
    )
    # TODO(synk): running_mean/running_var state updates of nn.BatchNorm2d
    # (track_running_stats) are not produced; only the forward activation is.
    print("KERNEL_OK")
</pallas_src>

<mosaic_0001>
module attributes {stable_mosaic.version = 11 : i64} {
  func.func @bn_relu_kernel(%arg0: i32, %arg1: memref<216x196xf32, #tpu.memory_space<vmem>>, %arg2: memref<216x2xf32, #tpu.memory_space<vmem>>, %arg3: memref<216x196xf32, #tpu.memory_space<vmem>>) attributes {dimension_semantics = [#tpu.dimension_semantics<parallel>], iteration_bounds = array<i64: 4>, scalar_prefetch = 0 : i64, scratch_operands = 0 : i64, tpu.core_type = #tpu.core_type<tc>, window_params = [{transform_indices = @transform_0, window_bounds = array<i64: 216, 196>}, {transform_indices = @transform_1, window_bounds = array<i64: 216, 2>}, {transform_indices = @transform_2, window_bounds = array<i64: 216, 196>}]} {
    %c0 = arith.constant 0 : index
    %c0_0 = arith.constant 0 : index
    %0 = vector.load %arg1[%c0, %c0_0] : memref<216x196xf32, #tpu.memory_space<vmem>>, vector<216x196xf32>
    %cst = arith.constant dense<0.000000e+00> : vector<216xf32>
    %1 = vector.multi_reduction <add>, %0, %cst [1] : vector<216x196xf32> to vector<216xf32>
    %2 = vector.shape_cast %1 : vector<216xf32> to vector<216x1xf32>
    %3 = arith.mulf %0, %0 : vector<216x196xf32>
    %cst_1 = arith.constant dense<0.000000e+00> : vector<216xf32>
    %4 = vector.multi_reduction <add>, %3, %cst_1 [1] : vector<216x196xf32> to vector<216xf32>
    %5 = vector.shape_cast %4 : vector<216xf32> to vector<216x1xf32>
    %cst_2 = arith.constant 0.00510204071 : f32
    %6 = vector.broadcast %cst_2 : f32 to vector<216x1xf32>
    %7 = arith.mulf %2, %6 : vector<216x1xf32>
    %cst_3 = arith.constant 0.00510204071 : f32
    %8 = vector.broadcast %cst_3 : f32 to vector<216x1xf32>
    %9 = arith.mulf %5, %8 : vector<216x1xf32>
    %10 = arith.mulf %7, %7 : vector<216x1xf32>
    %11 = arith.subf %9, %10 : vector<216x1xf32>
    %cst_4 = arith.constant 9.99999974E-6 : f32
    %12 = vector.broadcast %cst_4 : f32 to vector<216x1xf32>
    %13 = arith.addf %11, %12 : vector<216x1xf32>
    %14 = math.rsqrt %13 : vector<216x1xf32>
    %c0_5 = arith.constant 0 : index
    %c0_6 = arith.constant 0 : index
    %15 = vector.load %arg2[%c0_5, %c0_6] : memref<216x2xf32, #tpu.memory_space<vmem>>, vector<216x1xf32>
    %c0_7 = arith.constant 0 : index
    %c1 = arith.constant 1 : index
    %16 = vector.load %arg2[%c0_7, %c1] : memref<216x2xf32, #tpu.memory_space<vmem>>, vector<216x1xf32>
    %17 = arith.mulf %15, %14 : vector<216x1xf32>
    %18 = arith.mulf %7, %17 : vector<216x1xf32>
    %19 = arith.subf %16, %18 : vector<216x1xf32>
    %20 = vector.broadcast %17 : vector<216x1xf32> to vector<216x196xf32>
    %21 = arith.mulf %0, %20 : vector<216x196xf32>
    %22 = vector.broadcast %19 : vector<216x1xf32> to vector<216x196xf32>
    %23 = arith.addf %21, %22 : vector<216x196xf32>
    %cst_8 = arith.constant 0.000000e+00 : f32
    %24 = vector.broadcast %cst_8 : f32 to vector<216x196xf32>
    %25 = arith.maximumf %23, %24 : vector<216x196xf32>
    %c0_9 = arith.constant 0 : index
    %c0_10 = arith.constant 0 : index
    %26 = vector.load %arg3[%c0_9, %c0_10] : memref<216x196xf32, #tpu.memory_space<vmem>>, vector<216x196xf32>
    tpu.vector_store %arg3[%c0_9, %c0_10], %25 {strides = array<i32>} : memref<216x196xf32, #tpu.memory_space<vmem>>, vector<216x196xf32>,
    return
  }
  func.func @transform_0(%arg0: i32) -> (i32, i32) {
    %c0_i32 = arith.constant 0 : i32
    %c0_i32_0 = arith.constant 0 : i32
    return %arg0, %c0_i32 : i32, i32
  }
  func.func @transform_1(%arg0: i32) -> (i32, i32) {
    %c0_i32 = arith.constant 0 : i32
    %c0_i32_0 = arith.constant 0 : i32
    return %arg0, %c0_i32 : i32, i32
  }
  func.func @transform_2(%arg0: i32) -> (i32, i32) {
    %c0_i32 = arith.constant 0 : i32
    %c0_i32_0 = arith.constant 0 : i32
    return %arg0, %c0_i32 : i32, i32
  }
}

</mosaic_0001>

<bundles_post_ra>
// kernel: tpu_custom_call.1
= control target key start
LH: loop header
LB: loop body
LE: loop exit
PB: predicated region body
PF: predicated region fallthrough
CT: control target
= control target key end

     0   :  { %s1596_s9 = smov 0   ;;  %s2658_s0 = inlined_call_operand.vmem [shape: f32[864,196], index: 0, kind: input, shape index: {}]   ;;  %s2659_s1 = inlined_call_operand.vmem [shape: f32[864,2], index: 1, kind: input, shape index: {}]   ;;  %s2660_s2 = inlined_call_operand.vmem [shape: f32[864,196], index: 2, kind: output, shape index: {}]  }
   0x1 LB: > { %s1433_s10 = sadd.s32 4294967295, %s1576_s9   ;;  %p1437_p0 = scmp.ge.s32.totalorder %s1576_s9, 1  ;;  %s1576_s9 = sphi %s1596_s9, %s12_s9  }
   0x2   : > { %p125_p1 = scmp.lt.s32.totalorder %s1576_s9, 5 }
   0x4   : > { %p126_p2 = pnand %p1437_p0, %p125_p1 }
   0x6   : > { %129 = sbr.rel (%p126_p2) target bundleno = 539 (0x21b), region = 28 }
   0xb   : > { %s154_s11 = smul.u32 27, %s1433_s10  ;;  %vm228_vm0 = vcmask 556032   ;;  %s1579_s20 = smov 1  }
   0xd   : > { %p155_p3 = scmp.lt.s32.totalorder %s154_s11, 107 }
   0xf   : > { %s2668_s11 = smov (!%p155_p3, %s154_s11), 107 }
  0x10   : > { %s1445_s12 = sshll.u32 %s2668_s11, 4  ;;  %s1440_s16 = sshll.u32 %s2668_s11, 3 }
  0x11   : > { %s1612_s15 = scalar_lea.vmem %s2658_s0, %s1445_s12  ;;  %s2064_s19 = scalar_lea.vmem %s2659_s1, %s1440_s16 }
  0x12   : > { %v1615_v0 = vld [vmem:[%s1612_s15 + $0x20] sm:$0xff]  ;;  %v1618_v1 = vld [vmem:[%s1612_s15 + $0x28] sm:$0xff]  ;;  %v1629_v5 = vld [vmem:[%s1612_s15 + $0x30] sm:$0xff]  ;;  %s2474_s23 = scalar_lea.vmem %s2660_s2, %s1445_s12 }
  0x13   : > { %v1621_v2 = vld [vmem:[%s1612_s15] sm:$0xff]  ;;  %v237_v3 = vsel %vm228_vm0, %v1618_v1, 0.0  ;;  %v1626_v4 = vld [vmem:[%s1612_s15 + $0x8] sm:$0xff]  ;;  %v1632_v6 = vld [vmem:[%s1612_s15 + $0x38] sm:$0xff] }
  0x14   : > { %v238_v7 = vadd.f32 %v237_v3, %v1615_v0  ;;  %v229_v8 = vsel %vm228_vm0, %v1626_v4, 0.0  ;;  %v241_v9 = vsel %vm228_vm0, %v1632_v6, 0.0  ;;  %v1640_v10 = vld [vmem:[%s1612_s15 + $0x10] sm:$0xff]  ;;  %v1643_v11 = vld [vmem:[%s1612_s15 + $0x18] sm:$0xff]  ;;  %v1652_v15 = vld [vmem:[%s1612_s15 + $0x48] sm:$0xff] }
  0x15   : > { %v230_v12 = vadd.f32 %v229_v8, %v1621_v2  ;;  %v233_v13 = vsel %vm228_vm0, %v1643_v11, 0.0  ;;  %v1649_v14 = vld [vmem:[%s1612_s15 + $0x58] sm:$0xff]  ;;  %v242_v16 = vadd.f32 %v241_v9, %v1629_v5  ;;  %v1657_v18 = vld [vmem:[%s1612_s15 + $0x50] sm:$0xff]  ;;  %v1662_v20 = vld [vmem:[%s1612_s15 + $0x40] sm:$0xff]  ;;  %v245_v21 = vsel %vm228_vm0, %v1652_v15, 0.0 }
  0x16   : > { %239 = vadd.xlane.f32.xlu1 %v238_v7  ;;  %v234_v17 = vadd.f32 %v233_v13, %v1640_v10  ;;  %v249_v19 = vsel %vm228_vm0, %v1649_v14, 0.0  ;;  %v1667_v22 = vld [vmem:[%s1612_s15 + $0x78] sm:$0xff]  ;;  %v1670_v23 = vld [vmem:[%s1612_s15 + $0x68] sm:$0xff]  ;;  %v246_v25 = vadd.f32 %v245_v21, %v1662_v20  ;;  %v1675_v26 = vld [vmem:[%s1612_s15 + $0x70] sm:$0xff] }
  0x17   : > { %231 = vadd.xlane.f32.xlu0 %v230_v12  ;;  %v250_v24 = vadd.f32 %v249_v19, %v1657_v18  ;;  %v257_v27 = vsel %vm228_vm0, %v1667_v22, 0.0  ;;  %v1680_v28 = vld [vmem:[%s1612_s15 + $0x60] sm:$0xff]  ;;  %v253_v29 = vsel %vm228_vm0, %v1670_v23, 0.0  ;;  %v1685_v30 = vld [vmem:[%s1612_s15 + $0x98] sm:$0xff]  ;;  %v1688_v31 = vld [vmem:[%s1612_s15 + $0x88] sm:$0xff] }
  0x18   : > { %v258_v32 = vadd.f32 %v257_v27, %v1675_v26  ;;  %v254_v33 = vadd.f32 %v253_v29, %v1680_v28  ;;  %v1693_v34 = vld [vmem:[%s1612_s15 + $0x90] sm:$0xff]  ;;  %v265_v35 = vsel %vm228_vm0, %v1685_v30, 0.0  ;;  %v1698_v36 = vld [vmem:[%s1612_s15 + $0x80] sm:$0xff]  ;;  %v261_v37 = vsel %vm228_vm0, %v1688_v31, 0.0  ;;  %v1703_v38 = vld [vmem:[%s1612_s15 + $0xb8] sm:$0xff] }
  0x19   : > { %v1706_v39 = vld [vmem:[%s1612_s15 + $0xa8] sm:$0xff]  ;;  %v266_v40 = vadd.f32 %v265_v35, %v1693_v34  ;;  %v262_v41 = vadd.f32 %v261_v37, %v1698_v36  ;;  %v1711_v42 = vld [vmem:[%s1612_s15 + $0xb0] sm:$0xff]  ;;  %v273_v43 = vsel %vm228_vm0, %v1703_v38, 0.0  ;;  %v1716_v44 = vld [vmem:[%s1612_s15 + $0xa0] sm:$0xff] }
  0x1a   : > { %243 = vadd.xlane.f32.xlu1 %v242_v16  ;;  %v269_v45 = vsel %vm228_vm0, %v1706_v39, 0.0  ;;  %v1721_v46 = vld [vmem:[%s1612_s15 + $0xd8] sm:$0xff]  ;;  %v1724_v47 = vld [vmem:[%s1612_s15 + $0xc8] sm:$0xff]  ;;  %v274_v48 = vadd.f32 %v273_v43, %v1711_v42  ;;  %v1729_v50 = vld [vmem:[%s1612_s15 + $0xd0] sm:$0xff] }
  0x1b   : > { %235 = vadd.xlane.f32.xlu0 %v234_v17  ;;  %v270_v49 = vadd.f32 %v269_v45, %v1716_v44  ;;  %v281_v51 = vsel %vm228_vm0, %v1721_v46, 0.0  ;;  %v1734_v52 = vld [vmem:[%s1612_s15 + $0xc0] sm:$0xff]  ;;  %v277_v53 = vsel %vm228_vm0, %v1724_v47, 0.0  ;;  %v1739_v54 = vld [vmem:[%s1612_s15 + $0xf8] sm:$0xff]  ;;  %v1742_v55 = vld [vmem:[%s1612_s15 + $0xe8] sm:$0xff] }
  0x1c   : > { %v282_v56 = vadd.f32 %v281_v51, %v1729_v50  ;;  %v278_v57 = vadd.f32 %v277_v53, %v1734_v52  ;;  %v1747_v58 = vld [vmem:[%s1612_s15 + $0xf0] sm:$0xff]  ;;  %v289_v59 = vsel %vm228_vm0, %v1739_v54, 0.0  ;;  %v1752_v60 = vld [vmem:[%s1612_s15 + $0xe0] sm:$0xff]  ;;  %v285_v61 = vsel %vm228_vm0, %v1742_v55, 0.0  ;;  %v1757_v62 = vld [vmem:[%s1612_s15 + $0x118] sm:$0xff] }
  0x1d   : > { %v1760_v63 = vld [vmem:[%s1612_s15 + $0x108] sm:$0xff]  ;;  %v290_v3 = vadd.f32 %v289_v59, %v1747_v58  ;;  %v286_v7 = vadd.f32 %v285_v61, %v1752_v60  ;;  %v1765_v8 = vld [vmem:[%s1612_s15 + $0x110] sm:$0xff]  ;;  %v297_v9 = vsel %vm228_vm0, %v1757_v62, 0.0  ;;  %v1770_v12 = vld [vmem:[%s1612_s15 + $0x100] sm:$0xff] }
  0x1e   : > { %251 = vadd.xlane.f32.xlu1 %v250_v24  ;;  %v293_v13 = vsel %vm228_vm0, %v1760_v63, 0.0  ;;  %v1775_v16 = vld [vmem:[%s1612_s15 + $0x138] sm:$0xff]  ;;  %v1778_v17 = vld [vmem:[%s1612_s15 + $0x128] sm:$0xff]  ;;  %v298_v19 = vadd.f32 %v297_v9, %v1765_v8  ;;  %v1783_v24 = vld [vmem:[%s1612_s15 + $0x130] sm:$0xff] }
  0x1f   : > { %247 = vadd.xlane.f32.xlu0 %v246_v25  ;;  %v294_v21 = vadd.f32 %v293_v13, %v1770_v12  ;;  %v305_v25 = vsel %vm228_vm0, %v1775_v16, 0.0  ;;  %v1788_v27 = vld [vmem:[%s1612_s15 + $0x120] sm:$0xff]  ;;  %v301_v29 = vsel %vm228_vm0, %v1778_v17, 0.0 }
  0x20   : > { %v306_v35 = vadd.f32 %v305_v25, %v1783_v24  ;;  %v302_v37 = vadd.f32 %v301_v29, %v1788_v27  ;;  %v1806_v43 = vld [vmem:[%s1612_s15 + $0x140] sm:$0xff]  ;;  %v338_v25 = vmul.f32 %v1626_v4, %v1626_v4  ;;  %v342_v4 = vmul.f32 %v1618_v1, %v1618_v1 }
  0x21   : > { %v1824_v59 = vld [vmem:[%s1612_s15 + $0x160] sm:$0xff]  ;;  %v339_v1 = vmul.f32 %v1640_v10, %v1640_v10  ;;  %v343_v10 = vmul.f32 %v1629_v5, %v1629_v5  ;;  %v347_v5 = vmul.f32 %v1657_v18, %v1657_v18  ;;  %v351_v18 = vmul.f32 %v1675_v26, %v1675_v26 }
  0x22   : > { %259 = vadd.xlane.f32.xlu1 %v258_v32  ;;  %v1793_v32 = vld [vmem:[%s1612_s15 + $0x158] sm:$0xff]  ;;  %v1844_v29 = vld [vmem:[%s1612_s15 + $0x180] sm:$0xff]  ;;  %v355_v26 = vmul.f32 %v1693_v34, %v1693_v34  ;;  %v359_v34 = vmul.f32 %v1711_v42, %v1711_v42  ;;  %v363_v42 = vmul.f32 %v1729_v50, %v1729_v50  ;;  %v367_v50 = vmul.f32 %v1747_v58, %v1747_v58 }
  0x23   : > { %255 = vadd.xlane.f32.xlu0 %v254_v33  ;;  %v1796_v33 = vld [vmem:[%s1612_s15 + $0x148] sm:$0xff]  ;;  %v371_v58 = vmul.f32 %v1765_v8, %v1765_v8  ;;  %v375_v8 = vmul.f32 %v1783_v24, %v1783_v24 }
  0x24   : > { %v309_v45 = vsel %vm228_vm0, %v1796_v33, 0.0 }
  0x25   : > { %v310_v53 = vadd.f32 %v309_v45, %v1806_v43  ;;  %v337_v45 = vmul.f32 %v1621_v2, %v1621_v2  ;;  %v341_v2 = vmul.f32 %v1615_v0, %v1615_v0  ;;  %v345_v0 = vmul.f32 %v1662_v20, %v1662_v20 }
  0x26   : > { %267 = vadd.xlane.f32.xlu1 %v266_v40  ;;  %v1801_v40 = vld [vmem:[%s1612_s15 + $0x150] sm:$0xff]  ;;  %v349_v20 = vmul.f32 %v1680_v28, %v1680_v28  ;;  %v353_v28 = vmul.f32 %v1698_v36, %v1698_v36  ;;  %v357_v36 = vmul.f32 %v1716_v44, %v1716_v44  ;;  %v361_v44 = vmul.f32 %v1734_v52, %v1734_v52 }
  0x27   : > { %263 = vadd.xlane.f32.xlu0 %v262_v41  ;;  %v313_v41 = vsel %vm228_vm0, %v1793_v32, 0.0  ;;  %v365_v52 = vmul.f32 %v1752_v60, %v1752_v60  ;;  %v369_v60 = vmul.f32 %v1770_v12, %v1770_v12  ;;  %v373_v12 = vmul.f32 %v1788_v27, %v1788_v27 }
  0x28   : > { %v314_v51 = vadd.f32 %v313_v41, %v1801_v40  ;;  %v377_v27 = vmul.f32 %v1806_v43, %v1806_v43  ;;  %v381_v43 = vmul.f32 %v1824_v59, %v1824_v59  ;;  %v379_v24 = vmul.f32 %v1801_v40, %v1801_v40 }
  0x2a   : > { %275 = vadd.xlane.f32.xlu1 %v274_v48  ;;  %v1811_v48 = vld [vmem:[%s1612_s15 + $0x178] sm:$0xff] }
  0x2b   : > { %271 = vadd.xlane.f32.xlu0 %v270_v49  ;;  %v1814_v49 = vld [vmem:[%s1612_s15 + $0x168] sm:$0xff] }
  0x2c   : > { %v317_v61 = vsel %vm228_vm0, %v1814_v49, 0.0 }
  0x2d   : > { %v318_v13 = vadd.f32 %v317_v61, %v1824_v59  ;;  %v385_v59 = vmul.f32 %v1844_v29, %v1844_v29 }
  0x2e   : > { %283 = vadd.xlane.f32.xlu1 %v282_v56  ;;  %v1819_v56 = vld [vmem:[%s1612_s15 + $0x170] sm:$0xff] }
  0x2f   : > { %279 = vadd.xlane.f32.xlu0 %v278_v57  ;;  %v321_v57 = vsel %vm228_vm0, %v1811_v48, 0.0  ;;  %v383_v40 = vmul.f32 %v1819_v56, %v1819_v56 }
  0x30   : > { %v322_v9 = vadd.f32 %v321_v57, %v1819_v56  ;;  %v1859_v57 = vld [vmem:[%s1612_s15 + $0x1a0] sm:$0xff] }
  0x32   : > { %291 = vadd.xlane.f32.xlu1 %v290_v3  ;;  %v1829_v3 = vld [vmem:[%s1612_s15 + $0x198] sm:$0xff] }
  0x33   : > { %287 = vadd.xlane.f32.xlu0 %v286_v7  ;;  %v1832_v7 = vld [vmem:[%s1612_s15 + $0x188] sm:$0xff] }
  0x36   : > { %299 = vadd.xlane.f32.xlu1 %v298_v19  ;;  %v1837_v19 = vld [vmem:[%s1612_s15 + $0x190] sm:$0xff] }
  0x37   : > { %295 = vadd.xlane.f32.xlu0 %v294_v21  ;;  %2663 = vst [vmem:[#allocation2_spill] sm:$0xff] %v1837_v19  ;;  %v329_v21 = vsel %vm228_vm0, %v1829_v3, 0.0 }
  0x38   : > { %v330_v41 = vadd.f32 %v329_v21, %v1837_v19 }
  0x3a   : > { %307 = vadd.xlane.f32.xlu1 %v306_v35  ;;  %v325_v35 = vsel %vm228_vm0, %v1832_v7, 0.0 }
  0x3b   : > { %303 = vadd.xlane.f32.xlu0 %v302_v37  ;;  %v1849_v37 = vld [vmem:[%s1612_s15 + $0x1a8] sm:$0xff] }
  0x3c   : > { %v333_v61 = vsel %vm228_vm0, %v1849_v37, 0.0 }
  0x3e   : > { %315 = vadd.xlane.f32.xlu1 %v314_v51  ;;  %v326_v51 = vadd.f32 %v325_v35, %v1844_v29  ;;  %v346_v35 = vmul.f32 %v1652_v15, %v1652_v15  ;;  %v350_v15 = vmul.f32 %v1670_v23, %v1670_v23  ;;  %v354_v23 = vmul.f32 %v1688_v31, %v1688_v31 }
  0x3f   : > { %311 = vadd.xlane.f32.xlu0 %v310_v53  ;;  %v391_v53 = vsel %vm228_vm0, %v338_v25, 0.0  ;;  %v399_v25 = vsel %vm228_vm0, %v342_v4, 0.0  ;;  %v358_v31 = vmul.f32 %v1706_v39, %v1706_v39  ;;  %v362_v39 = vmul.f32 %v1724_v47, %v1724_v47 }
  0x40   : > { %v392_v21 = vadd.f32 %v391_v53, %v337_v45  ;;  %v366_v47 = vmul.f32 %v1742_v55, %v1742_v55  ;;  %v370_v55 = vmul.f32 %v1760_v63, %v1760_v63  ;;  %v374_v63 = vmul.f32 %v1778_v17, %v1778_v17 }
  0x41   : > { %v378_v17 = vmul.f32 %v1796_v33, %v1796_v33  ;;  %v382_v33 = vmul.f32 %v1814_v49, %v1814_v49  ;;  %v386_v49 = vmul.f32 %v1832_v7, %v1832_v7  ;;  %v390_v7 = vmul.f32 %v1849_v37, %v1849_v37 }
  0x42   : > { %323 = vadd.xlane.f32.xlu1 %v322_v9  ;;  %v340_v9 = vmul.f32 %v1643_v11, %v1643_v11  ;;  %v344_v11 = vmul.f32 %v1632_v6, %v1632_v6  ;;  %v348_v6 = vmul.f32 %v1649_v14, %v1649_v14  ;;  %v352_v14 = vmul.f32 %v1667_v22, %v1667_v22 }
  0x43   : > { %319 = vadd.xlane.f32.xlu0 %v318_v13  ;;  %v334_v13 = vadd.f32 %v333_v61, %v1859_v57  ;;  %v415_v61 = vsel %vm228_vm0, %v350_v15, 0.0  ;;  %v356_v22 = vmul.f32 %v1685_v30, %v1685_v30  ;;  %v360_v30 = vmul.f32 %v1703_v38, %v1703_v38 }
  0x44   : > { %v395_v19 = vsel %vm228_vm0, %v340_v9, 0.0  ;;  %v403_v53 = vsel %vm228_vm0, %v344_v11, 0.0  ;;  %v411_v9 = vsel %vm228_vm0, %v348_v6, 0.0  ;;  %v431_v11 = vsel %vm228_vm0, %v358_v31, 0.0 }
  0x45   : > { %v396_v45 = vadd.f32 %v395_v19, %v339_v1  ;;  %v404_v19 = vadd.f32 %v403_v53, %v343_v10  ;;  %v435_v10 = vsel %vm228_vm0, %v360_v30, 0.0  ;;  %v364_v38 = vmul.f32 %v1721_v46, %v1721_v46 }
  0x46   : > { %331 = vadd.xlane.f32.xlu1 %v330_v41  ;;  %v400_v41 = vadd.f32 %v399_v25, %v341_v2  ;;  %v412_v2 = vadd.f32 %v411_v9, %v347_v5  ;;  %v419_v25 = vsel %vm228_vm0, %v352_v14, 0.0  ;;  %v436_v53 = vadd.f32 %v435_v10, %v359_v34 }
  0x47   : > { %327 = vadd.xlane.f32.xlu0 %v326_v51  ;;  %v407_v51 = vsel %vm228_vm0, %v346_v35, 0.0  ;;  %v420_v35 = vadd.f32 %v419_v25, %v351_v18  ;;  %v447_v6 = vsel %vm228_vm0, %v366_v47, 0.0  ;;  %v368_v46 = vmul.f32 %v1739_v54, %v1739_v54 }
  0x48   : > { %v408_v4 = vadd.f32 %v407_v51, %v345_v0  ;;  %v432_v0 = vadd.f32 %v431_v11, %v357_v36  ;;  %v439_v51 = vsel %vm228_vm0, %v362_v39, 0.0  ;;  %v372_v54 = vmul.f32 %v1757_v62, %v1757_v62 }
  0x49   : > { %v440_v15 = vadd.f32 %v439_v51, %v361_v44  ;;  %v451_v5 = vsel %vm228_vm0, %v368_v46, 0.0  ;;  %v463_v14 = vsel %vm228_vm0, %v374_v63, 0.0  ;;  %v376_v62 = vmul.f32 %v1775_v16, %v1775_v16 }
  0x4a   : > { %393 = vadd.xlane.f32.xlu1 %v392_v21  ;;  %v416_v21 = vadd.f32 %v415_v61, %v349_v20  ;;  %v448_v20 = vadd.f32 %v447_v6, %v365_v52  ;;  %v455_v61 = vsel %vm228_vm0, %v370_v55, 0.0  ;;  %v452_v9 = vadd.f32 %v451_v5, %v367_v50 }
  0x4b   : > { %335 = vadd.xlane.f32.xlu0 %v334_v13  ;;  %v423_v13 = vsel %vm228_vm0, %v354_v23, 0.0  ;;  %v456_v23 = vadd.f32 %v455_v61, %v369_v60  ;;  %v467_v18 = vsel %vm228_vm0, %v376_v62, 0.0  ;;  %v380_v16 = vmul.f32 %v1793_v32, %v1793_v32 }
  0x4c   : > { %v424_v1 = vadd.f32 %v423_v13, %v353_v28  ;;  %v464_v28 = vadd.f32 %v463_v14, %v373_v12  ;;  %v471_v13 = vsel %vm228_vm0, %v378_v17, 0.0  ;;  %v468_v25 = vadd.f32 %v467_v18, %v375_v8 }
  0x4d   : > { %v472_v31 = vadd.f32 %v471_v13, %v377_v27  ;;  %v384_v32 = vmul.f32 %v1811_v48, %v1811_v48  ;;  %v487_v11 = vsel %vm228_vm0, %v386_v49, 0.0  ;;  %v388_v48 = vmul.f32 %v1829_v3, %v1829_v3 }
  0x4e   : > { %401 = vadd.xlane.f32.xlu1 %v400_v41  ;;  %v427_v41 = vsel %vm228_vm0, %v356_v22, 0.0  ;;  %v479_v22 = vsel %vm228_vm0, %v382_v33, 0.0  ;;  %v488_v39 = vadd.f32 %v487_v11, %v385_v59  ;;  %v389_v29 = vmul.f32 %v1859_v57, %v1859_v57 }
  0x4f   : > { %397 = vadd.xlane.f32.xlu0 %v396_v45  ;;  %v428_v45 = vadd.f32 %v427_v41, %v355_v26  ;;  %v480_v36 = vadd.f32 %v479_v22, %v381_v43  ;;  %v483_v26 = vsel %vm228_vm0, %v384_v32, 0.0  ;;  %v495_v30 = vsel %vm228_vm0, %v390_v7, 0.0 }
  0x50   : > { %v484_v41 = vadd.f32 %v483_v26, %v383_v40  ;;  %v491_v44 = vsel %vm228_vm0, %v388_v48, 0.0  ;;  %v496_v37 = vadd.f32 %v495_v30, %v389_v29  ;;  %v1578_v34 = vmov 0  }
  0x51   : > { %1459 = vset.pattern.permute.xlu0 %v1578_v34  ;;  %1458 = vset.pattern.permute.xlu1 %v1578_v34 }
  0x52   : > { %409 = vadd.xlane.f32.xlu1 %v408_v4  ;;  %v443_v4 = vsel %vm228_vm0, %v364_v38, 0.0 }
  0x53   : > { %405 = vadd.xlane.f32.xlu0 %v404_v19  ;;  %v444_v19 = vadd.f32 %v443_v4, %v363_v42 }
  0x56   : > { %417 = vadd.xlane.f32.xlu1 %v416_v21  ;;  %v459_v21 = vsel %vm228_vm0, %v372_v54, 0.0 }
  0x57   : > { %413 = vadd.xlane.f32.xlu0 %v412_v2  ;;  %v460_v2 = vadd.f32 %v459_v21, %v371_v58 }
  0x5a   : > { %425 = vadd.xlane.f32.xlu1 %v424_v1  ;;  %v475_v1 = vsel %vm228_vm0, %v380_v16, 0.0 }
  0x5b   : > { %421 = vadd.xlane.f32.xlu0 %v420_v35  ;;  %v476_v35 = vadd.f32 %v475_v1, %v379_v24 }
  0x5e   : > { %433 = vadd.xlane.f32.xlu1 %v432_v0  ;;  %v2664_v0 = vld [vmem:[#allocation2_spill] sm:$0xff] }
  0x5f   : > { %429 = vadd.xlane.f32.xlu0 %v428_v45  ;;  %v387_v56 = vmul.f32 %v2664_v0, %v2664_v0 }
  0x61   : > { %v492_v45 = vadd.f32 %v491_v44, %v387_v56 }
  0x62   : > { %441 = vadd.xlane.f32.xlu1 %v440_v15 }
  0x63   : > { %437 = vadd.xlane.f32.xlu0 %v436_v53 }
  0x66   : > { %449 = vadd.xlane.f32.xlu1 %v448_v20 }
  0x67   : > { %445 = vadd.xlane.f32.xlu0 %v444_v19 }
  0x6a   : > { %457 = vadd.xlane.f32.xlu1 %v456_v23 }
  0x6b   : > { %453 = vadd.xlane.f32.xlu0 %v452_v9 }
  0x6e   : > { %465 = vadd.xlane.f32.xlu1 %v464_v28 }
  0x6f   : > { %461 = vadd.xlane.f32.xlu0 %v460_v2 }
  0x72   : > { %473 = vadd.xlane.f32.xlu1 %v472_v31 }
  0x73   : > { %469 = vadd.xlane.f32.xlu0 %v468_v25 }
  0x76   : > { %481 = vadd.xlane.f32.xlu1 %v480_v36 }
  0x77   : > { %477 = vadd.xlane.f32.xlu0 %v476_v35 }
  0x7a   : > { %489 = vadd.xlane.f32.xlu1 %v488_v39 }
  0x7b   : > { %485 = vadd.xlane.f32.xlu0 %v484_v41 }
  0x7e   : > { %497 = vadd.xlane.f32.xlu1 %v496_v37 }
  0x7f   : > { %493 = vadd.xlane.f32.xlu0 %v492_v45 }
  0x9f   : > { %v240_v3 = vpop.xlane.xlu1 %239 }
  0xa0   : > { %v232_v51 = vpop.xlane.xlu0 %231  ;;  %v2028_v21 = vmul.f32 0.0051020407, %v240_v3 }
  0xa1   : > { %v2024_v14 = vmul.f32 0.0051020407, %v232_v51 }
  0xa2   : > { %v555_v33 = vmul.f32 %v2028_v21, %v2028_v21 }
  0xa3   : > { %v244_v57 = vpop.xlane.xlu1 %243  ;;  %v553_v62 = vmul.f32 %v2024_v14, %v2024_v14 }
  0xa4   : > { %v236_v47 = vpop.xlane.xlu0 %235  ;;  %v2040_v25 = vmul.f32 0.0051020407, %v244_v57 }
  0xa5   : > { %v2034_v2 = vmul.f32 0.0051020407, %v236_v47 }
  0xa6   : > { %v556_v7 = vmul.f32 %v2040_v25, %v2040_v25 }
  0xa7   : > { %v252_v10 = vpop.xlane.xlu1 %251  ;;  %v554_v22 = vmul.f32 %v2034_v2, %v2034_v2 }
  0xa8   : > { %v248_v38 = vpop.xlane.xlu0 %247  ;;  %v2050_v26 = vmul.f32 0.0051020407, %v252_v10 }
  0xa9   : > { %v2038_v18 = vmul.f32 0.0051020407, %v248_v38 }
  0xaa   : > { %v558_v3 = vmul.f32 %v2050_v26, %v2050_v26 }
  0xab   : > { %v260_v15 = vpop.xlane.xlu1 %259  ;;  %v557_v36 = vmul.f32 %v2038_v18, %v2038_v18 }
  0xac   : > { %v256_v52 = vpop.xlane.xlu0 %255  ;;  %v2059_v51 = vmul.f32 0.0051020407, %v260_v15 }
  0xad   : > { %v2046_v59 = vmul.f32 0.0051020407, %v256_v52 }
  0xaf   : > { %v1992_v53 = vpop.xlane.xlu1 %267  ;;  %v559_v0 = vmul.f32 %v2046_v59, %v2046_v59 }
  0xb0   : > { %v264_v6 = vpop.xlane.xlu0 %263 }
  0xb1   : > { %v2055_v56 = vmul.f32 0.0051020407, %v264_v6 }
  0xb3   : > { %v1994_v42 = vpop.xlane.xlu1 %275  ;;  %v561_v15 = vmul.f32 %v2055_v56, %v2055_v56 }
  0xb4   : > { %v1996_v55 = vpop.xlane.xlu0 %271 }
  0xb5   : > { %v2067_v10 = vmul.f32 0.0051020407, %v1996_v55 }
  0xb7   : > { %v1998_v4 = vpop.xlane.xlu1 %283 }
  0xb8   : > { %v2000_v46 = vpop.xlane.xlu0 %279 }
  0xbb   : > { %v2002_v20 = vpop.xlane.xlu1 %291 }
  0xbc   : > { %v2004_v60 = vpop.xlane.xlu0 %287 }
  0xbf   : > { %v2006_v19 = vpop.xlane.xlu1 %299 }
  0xc0   : > { %v2008_v61 = vpop.xlane.xlu0 %295 }
  0xc3   : > { %v2010_v50 = vpop.xlane.xlu1 %307 }
  0xc4   : > { %v2012_v63 = vpop.xlane.xlu0 %303 }
  0xc7   : > { %v2014_v5 = vpop.xlane.xlu1 %315 }
  0xc8   : > { %v2016_v54 = vpop.xlane.xlu0 %311 }
  0xcb   : > { %v2018_v23 = vpop.xlane.xlu1 %323 }
  0xcc   : > { %v2020_v12 = vpop.xlane.xlu0 %319 }
  0xcf   : > { %v2022_v9 = vpop.xlane.xlu1 %331 }
  0xd0   : > { %v2026_v58 = vpop.xlane.xlu0 %327 }
  0xd3   : > { %v394_v17 = vpop.xlane.xlu1 %393 }
  0xd4   : > { %v526_v28 = vmul.f32 0.0051020407, %v394_v17  ;;  %v2032_v27 = vpop.xlane.xlu0 %335 }
  0xd6   : > { %v580_v13 = vsub.f32 %v526_v28, %v553_v62  ;;  %v2072_v28 = vld [vmem:[%s2064_s19] sm:$0xff] }
  0xd7   : > { %v402_v8 = vpop.xlane.xlu1 %401 }
  0xd8   : > { %v607_v16 = vadd.f32 1e-05, %v580_v13  ;;  %v528_v31 = vmul.f32 0.0051020407, %v402_v8  ;;  %v398_v43 = vpop.xlane.xlu0 %397  ;;  %v560_v13 = vmul.f32 %v2059_v51, %v2059_v51  ;;  %v2077_v8 = vmul.f32 0.0051020407, %v1992_v53 }
  0xd9   : > { %v527_v24 = vmul.f32 0.0051020407, %v398_v43  ;;  %v2080_v43 = vmul.f32 0.0051020407, %v1994_v42 }
  0xda   : > { %1462 = vrsqrt.f32 %v607_v16  ;;  %v582_v49 = vsub.f32 %v528_v31, %v555_v33  ;;  %v562_v42 = vmul.f32 %v2077_v8, %v2077_v8 }
  0xdb   : > { %v581_v1 = vsub.f32 %v527_v24, %v554_v22  ;;  %v410_v32 = vpop.xlane.xlu1 %409  ;;  %v563_v22 = vmul.f32 %v2067_v10, %v2067_v10 }
  0xdc   : > { %v609_v35 = vadd.f32 1e-05, %v582_v49  ;;  %v530_v11 = vmul.f32 0.0051020407, %v410_v32  ;;  %v406_v40 = vpop.xlane.xlu0 %405 }
  0xdd   : > { %v608_v48 = vadd.f32 1e-05, %v581_v1  ;;  %v529_v39 = vmul.f32 0.0051020407, %v406_v40  ;;  %v2085_v1 = vmul.f32 0.0051020407, %v2000_v46 }
  0xde   : > { %1464 = vrsqrt.f32 %v609_v35  ;;  %v584_v29 = vsub.f32 %v530_v11, %v557_v36  ;;  %v2095_v46 = vld [vmem:[%s2064_s19 + $0x8] sm:$0xff] }
  0xdf   : > { %1466 = vrsqrt.f32 %v608_v48  ;;  %v583_v41 = vsub.f32 %v529_v39, %v556_v7  ;;  %v418_v30 = vpop.xlane.xlu1 %417 }
  0xe0   : > { %v611_v44 = vadd.f32 1e-05, %v584_v29  ;;  %v532_v37 = vmul.f32 0.0051020407, %v418_v30  ;;  %v414_v45 = vpop.xlane.xlu0 %413  ;;  %v564_v29 = vmul.f32 %v2080_v43, %v2080_v43 }
  0xe1   : > { %v610_v34 = vadd.f32 1e-05, %v583_v41  ;;  %v531_v57 = vmul.f32 0.0051020407, %v414_v45  ;;  %v565_v45 = vmul.f32 %v2085_v1, %v2085_v1 }
  0xe2   : > { %1468 = vrsqrt.f32 %v611_v44  ;;  %v586_v47 = vsub.f32 %v532_v37, %v559_v0  ;;  %v2100_v0 = vld [vmem:[%s2064_s19 + $0x20] sm:$0xff]  ;;  %v2103_v44 = vld [vmem:[%s2064_s19 + $0x10] sm:$0xff] }
  0xe3   : > { %1470 = vrsqrt.f32 %v610_v34  ;;  %v585_v38 = vsub.f32 %v531_v57, %v558_v3  ;;  %v426_v52 = vpop.xlane.xlu1 %425  ;;  %v2108_v3 = vmul.f32 0.0051020407, %v2004_v60 }
  0xe4   : > { %v613_v6 = vadd.f32 1e-05, %v586_v47  ;;  %v534_v17 = vmul.f32 0.0051020407, %v426_v52  ;;  %v422_v62 = vpop.xlane.xlu0 %421  ;;  %v2112_v47 = vmul.f32 0.0051020407, %v1998_v4 }
  0xe5   : > { %v612_v33 = vadd.f32 1e-05, %v585_v38  ;;  %v533_v55 = vmul.f32 0.0051020407, %v422_v62 }
  0xe6   : > { %1472 = vrsqrt.f32 %v613_v6  ;;  %v588_v16 = vsub.f32 %v534_v17, %v561_v15  ;;  %v2118_v6 = vmul.f32 0.0051020407, %v2008_v61 }
  0xe7   : > { %v1463_v31 = vpop.eup %1462  ;;  %1474 = vrsqrt.f32 %v612_v33  ;;  %v587_v24 = vsub.f32 %v533_v55, %v560_v13  ;;  %v434_v49 = vpop.xlane.xlu1 %433 }
  0xe8   : > { %v615_v53 = vadd.f32 1e-05, %v588_v16  ;;  %v536_v32 = vmul.f32 0.0051020407, %v434_v49  ;;  %v430_v36 = vpop.xlane.xlu0 %429  ;;  %v2088_v35 = vmul.f32 %v1463_v31, %v2072_v28  ;;  %v567_v16 = vmul.f32 %v2108_v3, %v2108_v3  ;;  %v2131_v49 = vld [vmem:[%s2064_s19 + $0x30] sm:$0xff] }
  0xe9   : > { %v614_v11 = vadd.f32 1e-05, %v587_v24  ;;  %v535_v40 = vmul.f32 0.0051020407, %v430_v36 }
  0xea   : > { %1476 = vrsqrt.f32 %v615_v53  ;;  %v590_v7 = vsub.f32 %v536_v32, %v563_v22  ;;  %v715_v48 = vmul.f32 %v2088_v35, %v2024_v14  ;;  %v2134_v53 = vld [vmem:[%s2064_s19 + $0x18] sm:$0xff]  ;;  %v2139_v32 = vmul.f32 0.0051020407, %v2002_v20 }
  0xeb   : > { %v1465_v39 = vpop.eup %1464  ;;  %1478 = vrsqrt.f32 %v614_v11  ;;  %v589_v41 = vsub.f32 %v535_v40, %v562_v42  ;;  %v442_v30 = vpop.xlane.xlu1 %441  ;;  %v569_v11 = vmul.f32 %v2118_v6, %v2118_v6 }
  0xec   : > { %v1467_v37 = vpop.eup %1466  ;;  %v617_v14 = vadd.f32 1e-05, %v590_v7  ;;  %v538_v34 = vmul.f32 0.0051020407, %v442_v30  ;;  %v438_v57 = vpop.xlane.xlu0 %437  ;;  %769 = vrot.lane.b32.xlu0 %v715_v48, %s1579_s20  ;;  %v2123_v33 = vmul.f32 %v1465_v39, %v2103_v44  ;;  %v2152_v30 = vld [vmem:[%s2064_s19 + $0x40] sm:$0xff] }
  0xed   : > { %v616_v38 = vadd.f32 1e-05, %v589_v41  ;;  %v537_v52 = vmul.f32 0.0051020407, %v438_v57  ;;  %v2115_v15 = vmul.f32 %v1467_v37, %v2095_v46  ;;  %v2155_v37 = vld [vmem:[%s2064_s19 + $0x28] sm:$0xff] }
  0xee   : > { %1480 = vrsqrt.f32 %v617_v14  ;;  %v592_v60 = vsub.f32 %v538_v34, %v565_v45  ;;  %v717_v20 = vmul.f32 %v2123_v33, %v2028_v21  ;;  %v2158_v14 = vmul.f32 0.0051020407, %v2012_v63 }
  0xef   : > { %v1469_v17 = vpop.eup %1468  ;;  %1482 = vrsqrt.f32 %v616_v38  ;;  %v591_v62 = vsub.f32 %v537_v52, %v564_v29  ;;  %v450_v13 = vpop.xlane.xlu1 %449  ;;  %v716_v4 = vmul.f32 %v2115_v15, %v2034_v2  ;;  %v566_v2 = vmul.f32 %v2112_v47, %v2112_v47 }
  0xf0   : > { %v1471_v55 = vpop.eup %1470  ;;  %v619_v31 = vadd.f32 1e-05, %v592_v60  ;;  %v540_v61 = vmul.f32 0.0051020407, %v450_v13  ;;  %v446_v22 = vpop.xlane.xlu0 %445  ;;  %v2128_v24 = vmul.f32 %v1469_v17, %v2100_v0  ;;  %v568_v21 = vmul.f32 %v2139_v32, %v2139_v32 }
  0xf1   : > { %v618_v36 = vadd.f32 1e-05, %v591_v62  ;;  %v539_v42 = vmul.f32 0.0051020407, %v446_v22  ;;  %771 = vrot.lane.b32.xlu1 %v716_v4, %s1579_s20  ;;  %v2149_v41 = vmul.f32 %v1471_v55, %v2134_v53  ;;  %v2167_v52 = vmul.f32 0.0051020407, %v2006_v19 }
  0xf2   : > { %1484 = vrsqrt.f32 %v619_v31  ;;  %v594_v40 = vsub.f32 %v540_v61, %v567_v16  ;;  %v719_v7 = vmul.f32 %v2128_v24, %v2038_v18  ;;  %v2171_v63 = vmul.f32 0.0051020407, %v2016_v54 }
  0xf3   : > { %v1473_v48 = vpop.eup %1472  ;;  %1486 = vrsqrt.f32 %v618_v36  ;;  %v593_v39 = vsub.f32 %v539_v42, %v566_v2  ;;  %v458_v29 = vpop.xlane.xlu1 %457  ;;  %v718_v19 = vmul.f32 %v2149_v41, %v2040_v25  ;;  %v571_v54 = vmul.f32 %v2158_v14, %v2158_v14  ;;  %v2187_v42 = vld [vmem:[%s2064_s19 + $0x50] sm:$0xff] }
  0xf4   : > { %v1475_v45 = vpop.eup %1474  ;;  %v621_v34 = vadd.f32 1e-05, %v594_v40  ;;  %v542_v18 = vmul.f32 0.0051020407, %v458_v29  ;;  %v454_v57 = vpop.xlane.xlu0 %453  ;;  %777 = vrot.lane.b32.xlu0 %v719_v7, %s1579_s20  ;;  %v2162_v38 = vmul.f32 %v1473_v48, %v2131_v49  ;;  %v570_v25 = vmul.f32 %v2167_v52, %v2167_v52 }
  0xf5   : > { %v620_v60 = vadd.f32 1e-05, %v593_v39  ;;  %v541_v17 = vmul.f32 0.0051020407, %v454_v57  ;;  %773 = vrot.lane.b32.xlu1 %v717_v20, %s1579_s20  ;;  %v2178_v31 = vmul.f32 %v1475_v45, %v2155_v37  ;;  %v2195_v40 = vmul.f32 0.0051020407, %v2010_v50 }
  0xf6   : > { %1488 = vrsqrt.f32 %v621_v34  ;;  %v596_v62 = vsub.f32 %v542_v18, %v569_v11  ;;  %v721_v13 = vmul.f32 %v2162_v38, %v2046_v59  ;;  %v2190_v11 = vld [vmem:[%s2064_s19 + $0x38] sm:$0xff]  ;;  %v573_v39 = vmul.f32 %v2171_v63, %v2171_v63 }
  0xf7   : > { %v1477_v4 = vpop.eup %1476  ;;  %1490 = vrsqrt.f32 %v620_v60  ;;  %v595_v55 = vsub.f32 %v541_v17, %v568_v21  ;;  %v466_v16 = vpop.xlane.xlu1 %465  ;;  %v720_v50 = vmul.f32 %v2178_v31, %v2050_v26  ;;  %v2208_v21 = vld [vmem:[%s2064_s19 + $0x60] sm:$0xff]  ;;  %v2211_v60 = vld [vmem:[%s2064_s19 + $0x48] sm:$0xff]  ;;  %v572_v26 = vmul.f32 %v2195_v40, %v2195_v40 }
  0xf8   : > { %v1479_v61 = vpop.eup %1478  ;;  %v623_v22 = vadd.f32 1e-05, %v596_v62  ;;  %v544_v2 = vmul.f32 0.0051020407, %v466_v16  ;;  %v462_v36 = vpop.xlane.xlu0 %461  ;;  %781 = vrot.lane.b32.xlu0 %v721_v13, %s1579_s20  ;;  %v2184_v59 = vmul.f32 %v1477_v4, %v2152_v30  ;;  %v2214_v62 = vmul.f32 0.0051020407, %v2020_v12 }
  0xf9   : > { %v622_v7 = vadd.f32 1e-05, %v595_v55  ;;  %v543_v48 = vmul.f32 0.0051020407, %v462_v36  ;;  %775 = vrot.lane.b32.xlu1 %v718_v19, %s1579_s20  ;;  %v2205_v57 = vmul.f32 %v1479_v61, %v2190_v11  ;;  %v2223_v16 = vmul.f32 0.0051020407, %v2014_v5 }
  0xfa   : > { %1492 = vrsqrt.f32 %v623_v22  ;;  %v598_v29 = vsub.f32 %v544_v2, %v571_v54  ;;  %v723_v20 = vmul.f32 %v2184_v59, %v2055_v56  ;;  %v2227_v12 = vmul.f32 0.0051020407, %v2026_v58 }
  0xfb   : > { %v1481_v45 = vpop.eup %1480  ;;  %1494 = vrsqrt.f32 %v622_v7  ;;  %v597_v34 = vsub.f32 %v543_v48, %v570_v25  ;;  %v474_v18 = vpop.xlane.xlu1 %473  ;;  %v722_v5 = vmul.f32 %v2205_v57, %v2059_v51  ;;  %v575_v58 = vmul.f32 %v2214_v62, %v2214_v62 }
  0xfc   : > { %v1483_v17 = vpop.eup %1482  ;;  %v625_v13 = vadd.f32 1e-05, %v598_v29  ;;  %v546_v56 = vmul.f32 0.0051020407, %v474_v18  ;;  %v470_v4 = vpop.xlane.xlu0 %469  ;;  %785 = vrot.lane.b32.xlu0 %v723_v20, %s1579_s20  ;;  %v2218_v55 = vmul.f32 %v1481_v45, %v2187_v42  ;;  %v2243_v45 = vld [vmem:[%s2064_s19 + $0x70] sm:$0xff]  ;;  %v574_v51 = vmul.f32 %v2223_v16, %v2223_v16 }
  0xfd   : > { %v624_v19 = vadd.f32 1e-05, %v597_v34  ;;  %v545_v61 = vmul.f32 0.0051020407, %v470_v4  ;;  %779 = vrot.lane.b32.xlu1 %v720_v50, %s1579_s20  ;;  %v2234_v7 = vmul.f32 %v1483_v17, %v2211_v60  ;;  %v2246_v34 = vld [vmem:[%s2064_s19 + $0x58] sm:$0xff] }
  0xfe   : > { %1496 = vrsqrt.f32 %v625_v13  ;;  %v600_v54 = vsub.f32 %v546_v56, %v573_v39  ;;  %v725_v22 = vmul.f32 %v2218_v55, %v2067_v10  ;;  %v2251_v18 = vmul.f32 0.0051020407, %v2018_v23 }
  0xff   : > { %v1485_v2 = vpop.eup %1484  ;;  %1498 = vrsqrt.f32 %v624_v19  ;;  %v599_v36 = vsub.f32 %v545_v61, %v572_v26  ;;  %v482_v25 = vpop.xlane.xlu1 %481  ;;  %v577_v13 = vmul.f32 %v2227_v12, %v2227_v12  ;;  %v724_v23 = vmul.f32 %v2234_v7, %v2077_v8 }
 0x100   : > { %v1487_v48 = vpop.eup %1486  ;;  %v627_v29 = vadd.f32 1e-05, %v600_v54  ;;  %v548_v39 = vmul.f32 0.0051020407, %v482_v25  ;;  %v478_v20 = vpop.xlane.xlu0 %477  ;;  %789 = vrot.lane.b32.xlu0 %v725_v22, %s1579_s20  ;;  %v2240_v10 = vmul.f32 %v1485_v2, %v2208_v21  ;;  %v2264_v22 = vld [vmem:[%s2064_s19 + $0x80] sm:$0xff]  ;;  %v2267_v2 = vld [vmem:[%s2064_s19 + $0x68] sm:$0xff]  ;;  %v576_v8 = vmul.f32 %v2251_v18, %v2251_v18 }
 0x101   : > { %v626_v50 = vadd.f32 1e-05, %v599_v36  ;;  %v547_v17 = vmul.f32 0.0051020407, %v478_v20  ;;  %783 = vrot.lane.b32.xlu1 %v722_v5, %s1579_s20  ;;  %v2261_v54 = vmul.f32 %v1487_v48, %v2246_v34  ;;  %v2270_v25 = vmul.f32 0.0051020407, %v2032_v27 }
 0x102   : > { %1500 = vrsqrt.f32 %v627_v29  ;;  %v602_v56 = vsub.f32 %v548_v39, %v575_v58  ;;  %v727_v4 = vmul.f32 %v2240_v10, %v2085_v1  ;;  %v2279_v48 = vmul.f32 0.0051020407, %v2022_v9 }
 0x103   : > { %v1489_v26 = vpop.eup %1488  ;;  %1502 = vrsqrt.f32 %v626_v50  ;;  %v601_v19 = vsub.f32 %v547_v17, %v574_v51  ;;  %v490_v61 = vpop.xlane.xlu1 %489 }
 0x104   : > { %v1491_v36 = vpop.eup %1490  ;;  %v629_v5 = vadd.f32 1e-05, %v602_v56  ;;  %v550_v1 = vmul.f32 0.0051020407, %v490_v61  ;;  %v486_v58 = vpop.xlane.xlu0 %485  ;;  %793 = vrot.lane.b32.xlu0 %v727_v4, %s1579_s20  ;;  %v2274_v29 = vmul.f32 %v1489_v26, %v2243_v45  ;;  %v726_v4 = vmul.f32 %v2261_v54, %v2080_v43 }
 0x105   : > { %v628_v39 = vadd.f32 1e-05, %v601_v19  ;;  %v549_v20 = vmul.f32 0.0051020407, %v486_v58  ;;  %787 = vrot.lane.b32.xlu1 %v724_v23, %s1579_s20  ;;  %v2287_v9 = vmul.f32 %v1491_v36, %v2267_v2  ;;  %v579_v19 = vmul.f32 %v2270_v25, %v2270_v25  ;;  %v2302_v58 = vld [vmem:[%s2064_s19 + $0x90] sm:$0xff] }
 0x106   : > { %1504 = vrsqrt.f32 %v629_v5  ;;  %v604_v27 = vsub.f32 %v550_v1, %v577_v13  ;;  %v729_v51 = vmul.f32 %v2274_v29, %v2108_v3  ;;  %v2296_v5 = vld [vmem:[%s2064_s19 + $0x78] sm:$0xff]  ;;  %v578_v43 = vmul.f32 %v2279_v48, %v2279_v48 }
 0x107   : > { %v1493_v50 = vpop.eup %1492  ;;  %1506 = vrsqrt.f32 %v628_v39  ;;  %v603_v17 = vsub.f32 %v549_v20, %v576_v8  ;;  %v498_v56 = vpop.xlane.xlu1 %497 }
 0x108   : > { %v1495_v26 = vpop.eup %1494  ;;  %v631_v61 = vadd.f32 1e-05, %v604_v27  ;;  %v552_v13 = vmul.f32 0.0051020407, %v498_v56  ;;  %v494_v23 = vpop.xlane.xlu0 %493  ;;  %797 = vrot.lane.b32.xlu0 %v729_v51, %s1579_s20  ;;  %v2293_v3 = vmul.f32 %v1493_v50, %v2264_v22  ;;  %v728_v51 = vmul.f32 %v2287_v9, %v2112_v47 }
 0x109   : > { %v630_v1 = vadd.f32 1e-05, %v603_v17  ;;  %v551_v36 = vmul.f32 0.0051020407, %v494_v23  ;;  %791 = vrot.lane.b32.xlu1 %v726_v4, %s1579_s20  ;;  %v2309_v50 = vmul.f32 %v1495_v26, %v2296_v5 }
 0x10a   : > { %1508 = vrsqrt.f32 %v631_v61  ;;  %v606_v8 = vsub.f32 %v552_v13, %v579_v19  ;;  %v731_v39 = vmul.f32 %v2293_v3, %v2118_v6  ;;  %v2316_v19 = vld [vmem:[%s2064_s19 + $0x88] sm:$0xff]  ;;  %v2320_v61 = vld [vmem:[%s2064_s19 + $0xa0] sm:$0xff] }
 0x10b   : > { %v1497_v20 = vpop.eup %1496  ;;  %1510 = vrsqrt.f32 %v630_v1  ;;  %v605_v27 = vsub.f32 %v551_v36, %v578_v43  ;;  %v730_v13 = vmul.f32 %v2309_v50, %v2139_v32  ;;  %v2330_v36 = vld [vmem:[%s2064_s19 + $0x98] sm:$0xff] }
 0x10c   : > { %v1499_v17 = vpop.eup %1498  ;;  %v633_v56 = vadd.f32 1e-05, %v606_v8  ;;  %801 = vrot.lane.b32.xlu0 %v731_v39, %s1579_s20  ;;  %v2313_v4 = vmul.f32 %v1497_v20, %v2302_v58  ;;  %2665 = vst [vmem:[#allocation2_spill] sm:$0xff] %v2330_v36  ;;  %v2334_v8 = vld [vmem:[%s2064_s19 + $0xb0] sm:$0xff] }
 0x10d   : > { %v632_v6 = vadd.f32 1e-05, %v605_v27  ;;  %795 = vrot.lane.b32.xlu1 %v728_v51, %s1579_s20  ;;  %v705_v23 = vmul.f32 %v1499_v17, %v2316_v19  ;;  %v2342_v17 = vld [vmem:[%s2064_s19 + $0xa8] sm:$0xff] }
 0x10e   : > { %1512 = vrsqrt.f32 %v633_v56  ;;  %v733_v47 = vmul.f32 %v2313_v4, %v2158_v14  ;;  %v2346_v56 = vld [vmem:[%s2064_s19 + $0xc0] sm:$0xff] }
 0x10f   : > { %v1501_v26 = vpop.eup %1500  ;;  %1514 = vrsqrt.f32 %v632_v6  ;;  %v732_v32 = vmul.f32 %v705_v23, %v2167_v52 }
 0x110   : > { %v1503_v43 = vpop.eup %1502  ;;  %805 = vrot.lane.b32.xlu0 %v733_v47, %s1579_s20  ;;  %v708_v1 = vmul.f32 %v1501_v26, %v2320_v61 }
 0x111   : > { %799 = vrot.lane.b32.xlu1 %v730_v13, %s1579_s20  ;;  %v707_v20 = vmul.f32 %v1503_v43, %v2330_v36  ;;  %v2354_v43 = vld [vmem:[%s2064_s19 + $0xb8] sm:$0xff] }
 0x112   : > { %v735_v14 = vmul.f32 %v708_v1, %v2171_v63 }
 0x113   : > { %v1505_v39 = vpop.eup %1504  ;;  %v734_v52 = vmul.f32 %v707_v20, %v2195_v40 }
 0x114   : > { %v1507_v27 = vpop.eup %1506  ;;  %809 = vrot.lane.b32.xlu0 %v735_v14, %s1579_s20  ;;  %v710_v51 = vmul.f32 %v1505_v39, %v2334_v8  ;;  %v2358_v14 = vld [vmem:[%s2064_s19 + $0xd0] sm:$0xff] }
 0x115   : > { %803 = vrot.lane.b32.xlu1 %v732_v32, %s1579_s20  ;;  %v709_v47 = vmul.f32 %v1507_v27, %v2342_v17 }
 0x116   : > { %v737_v63 = vmul.f32 %v710_v51, %v2214_v62 }
 0x117   : > { %v1509_v6 = vpop.eup %1508  ;;  %v736_v32 = vmul.f32 %v709_v47, %v2223_v16 }
 0x118   : > { %v1511_v26 = vpop.eup %1510  ;;  %813 = vrot.lane.b32.xlu0 %v737_v63, %s1579_s20  ;;  %v712_v13 = vmul.f32 %v1509_v6, %v2346_v56  ;;  %v2366_v63 = vld [vmem:[%s2064_s19 + $0xc8] sm:$0xff] }
 0x119   : > { %807 = vrot.lane.b32.xlu1 %v734_v52, %s1579_s20  ;;  %v711_v40 = vmul.f32 %v1511_v26, %v2354_v43 }
 0x11a   : > { %v739_v39 = vmul.f32 %v712_v13, %v2227_v12 }
 0x11b   : > { %v1513_v62 = vpop.eup %1512  ;;  %v738_v52 = vmul.f32 %v711_v40, %v2251_v18 }
 0x11c   : > { %v1515_v36 = vpop.eup %1514  ;;  %817 = vrot.lane.b32.xlu0 %v739_v39, %s1579_s20  ;;  %v714_v27 = vmul.f32 %v1513_v62, %v2358_v14 }
 0x11d   : > { %811 = vrot.lane.b32.xlu1 %v736_v32, %s1579_s20  ;;  %v713_v12 = vmul.f32 %v1515_v36, %v2366_v63 }
 0x11e   : > { %v741_v6 = vmul.f32 %v714_v27, %v2270_v25 }
 0x11f   : > { %v740_v16 = vmul.f32 %v713_v12, %v2279_v48 }
 0x120   : > { %821 = vrot.lane.b32.xlu0 %v741_v6, %s1579_s20 }
 0x121   : > { %815 = vrot.lane.b32.xlu1 %v738_v52, %s1579_s20 }
 0x124   : > { %884 = vperm.xlu0 %1459, %v2115_v15  }
 0x125   : > { %819 = vrot.lane.b32.xlu1 %v740_v16, %s1579_s20 }
 0x128   : > { %899 = vperm.xlu0 %1459, %v2128_v24  }
 0x129   : > { %879 = vperm.xlu1 %1458, %v2088_v35   ;;  %v1580_v35 = vmov 1  }
 0x12c   : > { %909 = vperm.xlu0 %1459, %v2162_v38  }
 0x12d   : > { %889 = vperm.xlu1 %1458, %v2123_v33  }
 0x130   : > { %919 = vperm.xlu0 %1459, %v2184_v59  }
 0x131   : > { %894 = vperm.xlu1 %1458, %v2149_v41  }
 0x134   : > { %929 = vperm.xlu0 %1459, %v2218_v55  }
 0x135   : > { %904 = vperm.xlu1 %1458, %v2178_v31  }
 0x138   : > { %939 = vperm.xlu0 %1459, %v2240_v10  }
 0x139   : > { %914 = vperm.xlu1 %1458, %v2205_v57  }
 0x13c   : > { %949 = vperm.xlu0 %1459, %v2274_v29  }
 0x13d   : > { %924 = vperm.xlu1 %1458, %v2234_v7  }
 0x140   : > { %959 = vperm.xlu0 %1459, %v2293_v3  }
 0x141   : > { %934 = vperm.xlu1 %1458, %v2261_v54  }
 0x144   : > { %969 = vperm.xlu0 %1459, %v2313_v4  }
 0x145   : > { %944 = vperm.xlu1 %1458, %v2287_v9  }
 0x148   : > { %979 = vperm.xlu0 %1459, %v708_v1  }
 0x149   : > { %954 = vperm.xlu1 %1458, %v2309_v50  }
 0x14c   : > { %989 = vperm.xlu0 %1459, %v710_v51  }
 0x14d   : > { %964 = vperm.xlu1 %1458, %v705_v23  }
 0x150   : > { %999 = vperm.xlu0 %1459, %v712_v13   ;;  %v2666_v13 = vld [vmem:[#allocation2_spill] sm:$0xff] }
 0x151   : > { %974 = vperm.xlu1 %1458, %v707_v20  }
 0x154   : > { %1009 = vperm.xlu0 %1459, %v714_v27  }
 0x155   : > { %984 = vperm.xlu1 %1458, %v709_v47  }
 0x158   : > { %1461 = vset.pattern.permute.xlu0 %v1580_v35 }
 0x159   : > { %994 = vperm.xlu1 %1458, %v711_v40  }
 0x15d   : > { %1004 = vperm.xlu1 %1458, %v713_v12  }
 0x15e   : > { %v770_v15 = vpop.permute.xlu0 %769 }
 0x15f   : > { %v850_v33 = vsub.f32 %v2072_v28, %v770_v15 }
 0x161   : > { %1460 = vset.pattern.permute.xlu1 %v1580_v35 }
 0x162   : > { %1068 = vperm.xlu1 %1460, %v850_v33  }
 0x163   : > { %v772_v24 = vpop.permute.xlu1 %771 }
 0x164   : > { %v851_v41 = vsub.f32 %v2095_v46, %v772_v24 }
 0x166   : > { %1073 = vperm.xlu0 %1461, %v851_v41   ;;  %v778_v38 = vpop.permute.xlu0 %777 }
 0x167   : > { %v774_v31 = vpop.permute.xlu1 %773  ;;  %v854_v59 = vsub.f32 %v2100_v0, %v778_v38 }
 0x168   : > { %v852_v57 = vsub.f32 %v2103_v44, %v774_v31 }
 0x16a   : > { %1078 = vperm.xlu1 %1460, %v852_v57   ;;  %1088 = vperm.xlu0 %1461, %v854_v59   ;;  %v782_v55 = vpop.permute.xlu0 %781 }
 0x16b   : > { %v776_v7 = vpop.permute.xlu1 %775  ;;  %v856_v10 = vsub.f32 %v2131_v49, %v782_v55 }
 0x16c   : > { %v853_v28 = vsub.f32 %v2134_v53, %v776_v7 }
 0x16e   : > { %1083 = vperm.xlu1 %1460, %v853_v28   ;;  %1098 = vperm.xlu0 %1461, %v856_v10   ;;  %v786_v18 = vpop.permute.xlu0 %785 }
 0x16f   : > { %v780_v54 = vpop.permute.xlu1 %779  ;;  %v858_v46 = vsub.f32 %v2152_v30, %v786_v18 }
 0x170   : > { %v855_v25 = vsub.f32 %v2155_v37, %v780_v54 }
 0x172   : > { %1093 = vperm.xlu1 %1460, %v855_v25   ;;  %1108 = vperm.xlu0 %1461, %v858_v46   ;;  %v790_v0 = vpop.permute.xlu0 %789 }
 0x173   : > { %v784_v44 = vpop.permute.xlu1 %783  ;;  %v860_v29 = vsub.f32 %v2187_v42, %v790_v0 }
 0x174   : > { %v857_v48 = vsub.f32 %v2190_v11, %v784_v44  ;;  %v1516_v44 = vld [vmem:[%s1612_s15] sm:$0xff] }
 0x176   : > { %1103 = vperm.xlu1 %1460, %v857_v48   ;;  %1118 = vperm.xlu0 %1461, %v860_v29   ;;  %v794_v49 = vpop.permute.xlu0 %793  ;;  %v1517_v48 = vld [vmem:[%s1612_s15 + $0x8] sm:$0xff] }
 0x177   : > { %v788_v53 = vpop.permute.xlu1 %787  ;;  %v862_v9 = vsub.f32 %v2208_v21, %v794_v49 }
 0x178   : > { %v859_v3 = vsub.f32 %v2211_v60, %v788_v53 }
 0x17a   : > { %1113 = vperm.xlu1 %1460, %v859_v3   ;;  %1128 = vperm.xlu0 %1461, %v862_v9   ;;  %v798_v30 = vpop.permute.xlu0 %797 }
 0x17b   : > { %v792_v37 = vpop.permute.xlu1 %791  ;;  %v864_v50 = vsub.f32 %v2243_v45, %v798_v30 }
 0x17c   : > { %v861_v4 = vsub.f32 %v2246_v34, %v792_v37  ;;  %v1518_v37 = vld [vmem:[%s1612_s15 + $0x10] sm:$0xff] }
 0x17e   : > { %1123 = vperm.xlu1 %1460, %v861_v4   ;;  %1138 = vperm.xlu0 %1461, %v864_v50   ;;  %v802_v42 = vpop.permute.xlu0 %801  ;;  %v1519_v4 = vld [vmem:[%s1612_s15 + $0x18] sm:$0xff] }
 0x17f   : > { %v796_v11 = vpop.permute.xlu1 %795  ;;  %v866_v23 = vsub.f32 %v2264_v22, %v802_v42 }
 0x180   : > { %v863_v1 = vsub.f32 %v2267_v2, %v796_v11 }
 0x182   : > { %1133 = vperm.xlu1 %1460, %v863_v1   ;;  %1148 = vperm.xlu0 %1461, %v866_v23   ;;  %v806_v21 = vpop.permute.xlu0 %805 }
 0x183   : > { %v800_v60 = vpop.permute.xlu1 %799  ;;  %v868_v36 = vsub.f32 %v2302_v58, %v806_v21 }
 0x184   : > { %v865_v20 = vsub.f32 %v2296_v5, %v800_v60 }
 0x186   : > { %1143 = vperm.xlu1 %1460, %v865_v20   ;;  %1158 = vperm.xlu0 %1461, %v868_v36   ;;  %v810_v45 = vpop.permute.xlu0 %809  ;;  %v1520_v36 = vld [vmem:[%s1612_s15 + $0x40] sm:$0xff] }
 0x187   : > { %v804_v34 = vpop.permute.xlu1 %803  ;;  %v870_v51 = vsub.f32 %v2320_v61, %v810_v45  ;;  %v1521_v45 = vld [vmem:[%s1612_s15 + $0x48] sm:$0xff] }
 0x188   : > { %v867_v47 = vsub.f32 %v2316_v19, %v804_v34 }
 0x18a   : > { %1153 = vperm.xlu1 %1460, %v867_v47   ;;  %1168 = vperm.xlu0 %1461, %v870_v51   ;;  %v814_v22 = vpop.permute.xlu0 %813  ;;  %v1522_v51 = vld [vmem:[%s1612_s15 + $0x20] sm:$0xff] }
 0x18b   : > { %v808_v2 = vpop.permute.xlu1 %807  ;;  %v872_v26 = vsub.f32 %v2334_v8, %v814_v22  ;;  %v1523_v22 = vld [vmem:[%s1612_s15 + $0x28] sm:$0xff] }
 0x18c   : > { %v869_v39 = vsub.f32 %v2666_v13, %v808_v2 }
 0x18e   : > { %1163 = vperm.xlu1 %1460, %v869_v39   ;;  %1178 = vperm.xlu0 %1461, %v872_v26   ;;  %v818_v58 = vpop.permute.xlu0 %817 }
 0x18f   : > { %v812_v5 = vpop.permute.xlu1 %811  ;;  %v874_v62 = vsub.f32 %v2346_v56, %v818_v58 }
 0x190   : > { %v871_v32 = vsub.f32 %v2342_v17, %v812_v5 }
 0x192   : > { %1173 = vperm.xlu1 %1460, %v871_v32   ;;  %1188 = vperm.xlu0 %1461, %v874_v62   ;;  %v822_v61 = vpop.permute.xlu0 %821 }
 0x193   : > { %v816_v19 = vpop.permute.xlu1 %815  ;;  %v876_v40 = vsub.f32 %v2358_v14, %v822_v61 }
 0x194   : > { %v873_v27 = vsub.f32 %v2354_v43, %v816_v19  ;;  %v1524_v19 = vld [vmem:[%s1612_s15 + $0x60] sm:$0xff] }
 0x196   : > { %1183 = vperm.xlu1 %1460, %v873_v27   ;;  %1198 = vperm.xlu0 %1461, %v876_v40   ;;  %v1525_v27 = vld [vmem:[%s1612_s15 + $0x68] sm:$0xff] }
 0x197   : > { %v820_v8 = vpop.permute.xlu1 %819 }
 0x198   : > { %v875_v6 = vsub.f32 %v2366_v63, %v820_v8 }
 0x19a   : > { %1193 = vperm.xlu1 %1460, %v875_v6   ;;  %v1526_v6 = vld [vmem:[%s1612_s15 + $0x30] sm:$0xff] }
 0x19f   : > { %v885_v52 = vpop.permute.xlu0 %884 }
 0x1a0   : > { %v1014_v50 = vmul.f32 %v1518_v37, %v885_v52  ;;  %v1015_v42 = vmul.f32 %v1519_v4, %v885_v52  ;;  %v1528_v37 = vld [vmem:[%s1612_s15 + $0x80] sm:$0xff]  ;;  %v1529_v4 = vld [vmem:[%s1612_s15 + $0x88] sm:$0xff] }
 0x1a3   : > { %v900_v12 = vpop.permute.xlu0 %899 }
 0x1a4   : > { %v880_v16 = vpop.permute.xlu1 %879  ;;  %v1020_v20 = vmul.f32 %v1520_v36, %v900_v12  ;;  %v1021_v34 = vmul.f32 %v1521_v45, %v900_v12  ;;  %v1527_v12 = vld [vmem:[%s1612_s15 + $0x38] sm:$0xff] }
 0x1a5   : > { %v1012_v29 = vmul.f32 %v1516_v44, %v880_v16  ;;  %v1013_v49 = vmul.f32 %v1517_v48, %v880_v16 }
 0x1a7   : > { %v2421_v56 = vpop.permute.xlu0 %909 }
 0x1a8   : > { %v890_v17 = vpop.permute.xlu1 %889  ;;  %v1024_v40 = vmul.f32 %v1524_v19, %v2421_v56  ;;  %v1025_v8 = vmul.f32 %v1525_v27, %v2421_v56 }
 0x1a9   : > { %v1016_v47 = vmul.f32 %v1522_v51, %v890_v17  ;;  %v1017_v2 = vmul.f32 %v1523_v22, %v890_v17 }
 0x1ab   : > { %v2423_v35 = vpop.permute.xlu0 %919 }
 0x1ac   : > { %v2425_v15 = vpop.permute.xlu1 %894 }
 0x1ad   : > { %v1018_v52 = vmul.f32 %v1526_v6, %v2425_v15  ;;  %v1019_v16 = vmul.f32 %v1527_v12, %v2425_v15 }
 0x1af   : > { %v2427_v33 = vpop.permute.xlu0 %929 }
 0x1b0   : > { %v2429_v14 = vpop.permute.xlu1 %904 }
 0x1b3   : > { %v2431_v43 = vpop.permute.xlu0 %939 }
 0x1b4   : > { %v2433_v24 = vpop.permute.xlu1 %914 }
 0x1b7   : > { %v2437_v41 = vpop.permute.xlu0 %949 }
 0x1b8   : > { %v2435_v63 = vpop.permute.xlu1 %924 }
 0x1bb   : > { %v2441_v31 = vpop.permute.xlu0 %959 }
 0x1bc   : > { %v2439_v38 = vpop.permute.xlu1 %934 }
 0x1bf   : > { %v2447_v55 = vpop.permute.xlu0 %969 }
 0x1c0   : > { %v2443_v59 = vpop.permute.xlu1 %944 }
 0x1c3   : > { %v2451_v10 = vpop.permute.xlu0 %979 }
 0x1c4   : > { %v2445_v57 = vpop.permute.xlu1 %954 }
 0x1c7   : > { %v2457_v54 = vpop.permute.xlu0 %989 }
 0x1c8   : > { %v2449_v7 = vpop.permute.xlu1 %964 }
 0x1cb   : > { %v2461_v25 = vpop.permute.xlu0 %999 }
 0x1cc   : > { %v2453_v28 = vpop.permute.xlu1 %974 }
 0x1cf   : > { %v2467_v53 = vpop.permute.xlu0 %1009 }
 0x1d0   : > { %v2455_v18 = vpop.permute.xlu1 %984 }
 0x1d4   : > { %v2459_v46 = vpop.permute.xlu1 %994 }
 0x1d8   : > { %v2463_v0 = vpop.permute.xlu1 %1004 }
 0x1dd   : > { %v1069_v9 = vpop.permute.xlu1 %1068 }
 0x1de   : > { %v1201_v3 = vadd.f32 %v1069_v9, %v1012_v29  ;;  %v1202_v30 = vadd.f32 %v1069_v9, %v1013_v49 }
 0x1e0   : > { %v1255_v11 = vmax.f32 %v1201_v3, 0.0  ;;  %v1256_v23 = vmax.f32 %v1202_v30, 0.0 }
 0x1e1   : > { %v1074_v1 = vpop.permute.xlu0 %1073 }
 0x1e2   : > { %1309 = vst [vmem:[%s2474_s23] sm:$0xff] %v1255_v11  ;;  %1310 = vst.msk [vmem:[%s2474_s23 + $0x8] sm:$0xff] %vm228_vm0, %v1256_v23  ;;  %v1203_v21 = vadd.f32 %v1074_v1, %v1014_v50  ;;  %v1204_v60 = vadd.f32 %v1074_v1, %v1015_v42  ;;  %v1028_v50 = vmul.f32 %v1528_v37, %v2423_v35  ;;  %v1530_v11 = vld [vmem:[%s1612_s15 + $0x50] sm:$0xff]  ;;  %v1531_v1 = vld [vmem:[%s1612_s15 + $0x58] sm:$0xff] }
 0x1e3   : > { %v1029_v42 = vmul.f32 %v1529_v4, %v2423_v35  ;;  %v1022_v23 = vmul.f32 %v1530_v11, %v2429_v14 }
 0x1e4   : > { %v1257_v26 = vmax.f32 %v1203_v21, 0.0  ;;  %v1258_v13 = vmax.f32 %v1204_v60, 0.0  ;;  %v1023_v21 = vmul.f32 %v1531_v1, %v2429_v14 }
 0x1e5   : > { %v1079_v39 = vpop.permute.xlu1 %1078  ;;  %v1089_v58 = vpop.permute.xlu0 %1088 }
 0x1e6   : > { %1311 = vst [vmem:[%s2474_s23 + $0x10] sm:$0xff] %v1257_v26  ;;  %1312 = vst.msk [vmem:[%s2474_s23 + $0x18] sm:$0xff] %vm228_vm0, %v1258_v13  ;;  %v1205_v5 = vadd.f32 %v1079_v39, %v1016_v47  ;;  %v1206_v62 = vadd.f32 %v1079_v39, %v1017_v2  ;;  %v1209_v32 = vadd.f32 %v1089_v58, %v1020_v20  ;;  %v1532_v2 = vld [vmem:[%s1612_s15 + $0xa0] sm:$0xff]  ;;  %v1533_v13 = vld [vmem:[%s1612_s15 + $0xa8] sm:$0xff] }
 0x1e7   : > { %v1210_v61 = vadd.f32 %v1089_v58, %v1021_v34  ;;  %v1032_v26 = vmul.f32 %v1532_v2, %v2427_v33  ;;  %v1033_v39 = vmul.f32 %v1533_v13, %v2427_v33  ;;  %v1534_v58 = vld [vmem:[%s1612_s15 + $0x70] sm:$0xff] }
 0x1e8   : > { %v1259_v17 = vmax.f32 %v1205_v5, 0.0  ;;  %v1260_v44 = vmax.f32 %v1206_v62, 0.0  ;;  %v1263_v29 = vmax.f32 %v1209_v32, 0.0  ;;  %v1026_v5 = vmul.f32 %v1534_v58, %v2433_v24  ;;  %v1535_v62 = vld [vmem:[%s1612_s15 + $0x78] sm:$0xff] }
 0x1e9   : > { %v1264_v48 = vmax.f32 %v1210_v61, 0.0  ;;  %v1084_v49 = vpop.permute.xlu1 %1083  ;;  %v1099_v9 = vpop.permute.xlu0 %1098  ;;  %v1027_v32 = vmul.f32 %v1535_v62, %v2433_v24 }
 0x1ea   : > { %1313 = vst [vmem:[%s2474_s23 + $0x20] sm:$0xff] %v1259_v17  ;;  %1314 = vst.msk [vmem:[%s2474_s23 + $0x28] sm:$0xff] %vm228_vm0, %v1260_v44  ;;  %v1207_v56 = vadd.f32 %v1084_v49, %v1018_v52  ;;  %v1208_v3 = vadd.f32 %v1084_v49, %v1019_v16  ;;  %v1213_v30 = vadd.f32 %v1099_v9, %v1024_v40  ;;  %v1536_v16 = vld [vmem:[%s1612_s15 + $0xc0] sm:$0xff]  ;;  %v1537_v44 = vld [vmem:[%s1612_s15 + $0xc8] sm:$0xff] }
 0x1eb   : > { %1317 = vst [vmem:[%s2474_s23 + $0x40] sm:$0xff] %v1263_v29  ;;  %1318 = vst.msk [vmem:[%s2474_s23 + $0x48] sm:$0xff] %vm228_vm0, %v1264_v48  ;;  %v1214_v15 = vadd.f32 %v1099_v9, %v1025_v8  ;;  %v1036_v17 = vmul.f32 %v1536_v16, %v2431_v43  ;;  %v1037_v29 = vmul.f32 %v1537_v44, %v2431_v43  ;;  %v1538_v48 = vld [vmem:[%s1612_s15 + $0x90] sm:$0xff]  ;;  %v1539_v9 = vld [vmem:[%s1612_s15 + $0x98] sm:$0xff] }
 0x1ec   : > { %v1261_v60 = vmax.f32 %v1207_v56, 0.0  ;;  %v1262_v36 = vmax.f32 %v1208_v3, 0.0  ;;  %v1267_v20 = vmax.f32 %v1213_v30, 0.0  ;;  %v1030_v49 = vmul.f32 %v1538_v48, %v2435_v63 }
 0x1ed   : > { %v1268_v45 = vmax.f32 %v1214_v15, 0.0  ;;  %v1094_v34 = vpop.permute.xlu1 %1093  ;;  %v1109_v51 = vpop.permute.xlu0 %1108  ;;  %v1031_v56 = vmul.f32 %v1539_v9, %v2435_v63 }
 0x1ee   : > { %1315 = vst [vmem:[%s2474_s23 + $0x30] sm:$0xff] %v1261_v60  ;;  %1316 = vst.msk [vmem:[%s2474_s23 + $0x38] sm:$0xff] %vm228_vm0, %v1262_v36  ;;  %v1211_v35 = vadd.f32 %v1094_v34, %v1022_v23  ;;  %v1212_v47 = vadd.f32 %v1094_v34, %v1023_v21  ;;  %v1217_v22 = vadd.f32 %v1109_v51, %v1028_v50  ;;  %v1540_v23 = vld [vmem:[%s1612_s15 + $0xe0] sm:$0xff]  ;;  %v1541_v21 = vld [vmem:[%s1612_s15 + $0xe8] sm:$0xff] }
 0x1ef   : > { %1321 = vst [vmem:[%s2474_s23 + $0x60] sm:$0xff] %v1267_v20  ;;  %1322 = vst.msk [vmem:[%s2474_s23 + $0x68] sm:$0xff] %vm228_vm0, %v1268_v45  ;;  %v1218_v14 = vadd.f32 %v1109_v51, %v1029_v42  ;;  %v1040_v1 = vmul.f32 %v1540_v23, %v2437_v41  ;;  %v1041_v60 = vmul.f32 %v1541_v21, %v2437_v41  ;;  %v1542_v36 = vld [vmem:[%s1612_s15 + $0xb0] sm:$0xff]  ;;  %v1543_v45 = vld [vmem:[%s1612_s15 + $0xb8] sm:$0xff] }
 0x1f0   : > { %v1265_v61 = vmax.f32 %v1211_v35, 0.0  ;;  %v1266_v19 = vmax.f32 %v1212_v47, 0.0  ;;  %v1271_v40 = vmax.f32 %v1217_v22, 0.0  ;;  %v1034_v20 = vmul.f32 %v1542_v36, %v2439_v38 }
 0x1f1   : > { %v1272_v27 = vmax.f32 %v1218_v14, 0.0  ;;  %v1104_v8 = vpop.permute.xlu1 %1103  ;;  %v1119_v6 = vpop.permute.xlu0 %1118  ;;  %v1035_v34 = vmul.f32 %v1543_v45, %v2439_v38 }
 0x1f2   : > { %1319 = vst [vmem:[%s2474_s23 + $0x50] sm:$0xff] %v1265_v61  ;;  %1320 = vst.msk [vmem:[%s2474_s23 + $0x58] sm:$0xff] %vm228_vm0, %v1266_v19  ;;  %v1215_v33 = vadd.f32 %v1104_v8, %v1026_v5  ;;  %v1216_v52 = vadd.f32 %v1104_v8, %v1027_v32  ;;  %v1221_v12 = vadd.f32 %v1119_v6, %v1032_v26  ;;  %v1545_v5 = vld [vmem:[%s1612_s15 + $0x108] sm:$0xff]  ;;  %v1546_v32 = vld [vmem:[%s1612_s15 + $0xd0] sm:$0xff] }
 0x1f3   : > { %1325 = vst [vmem:[%s2474_s23 + $0x80] sm:$0xff] %v1271_v40  ;;  %1326 = vst.msk [vmem:[%s2474_s23 + $0x88] sm:$0xff] %vm228_vm0, %v1272_v27  ;;  %v1222_v24 = vadd.f32 %v1119_v6, %v1033_v39  ;;  %v1544_v39 = vld [vmem:[%s1612_s15 + $0x100] sm:$0xff]  ;;  %v1045_v62 = vmul.f32 %v1545_v5, %v2441_v31  ;;  %v1038_v61 = vmul.f32 %v1546_v32, %v2443_v59  ;;  %v1547_v19 = vld [vmem:[%s1612_s15 + $0xd8] sm:$0xff] }
 0x1f4   : > { %v1269_v3 = vmax.f32 %v1215_v33, 0.0  ;;  %v1270_v30 = vmax.f32 %v1216_v52, 0.0  ;;  %v1275_v15 = vmax.f32 %v1221_v12, 0.0  ;;  %v1044_v58 = vmul.f32 %v1544_v39, %v2441_v31 }
 0x1f5   : > { %v1276_v37 = vmax.f32 %v1222_v24, 0.0  ;;  %v1114_v50 = vpop.permute.xlu1 %1113  ;;  %v1129_v4 = vpop.permute.xlu0 %1128  ;;  %v1039_v40 = vmul.f32 %v1547_v19, %v2443_v59 }
 0x1f6   : > { %1323 = vst [vmem:[%s2474_s23 + $0x70] sm:$0xff] %v1269_v3  ;;  %1324 = vst.msk [vmem:[%s2474_s23 + $0x78] sm:$0xff] %vm228_vm0, %v1270_v30  ;;  %v1219_v43 = vadd.f32 %v1114_v50, %v1030_v49  ;;  %v1220_v42 = vadd.f32 %v1114_v50, %v1031_v56  ;;  %v1225_v11 = vadd.f32 %v1129_v4, %v1036_v17  ;;  %v1548_v17 = vld [vmem:[%s1612_s15 + $0x120] sm:$0xff]  ;;  %v1550_v49 = vld [vmem:[%s1612_s15 + $0xf0] sm:$0xff] }
 0x1f7   : > { %1329 = vst [vmem:[%s2474_s23 + $0xa0] sm:$0xff] %v1275_v15  ;;  %1330 = vst.msk [vmem:[%s2474_s23 + $0xa8] sm:$0xff] %vm228_vm0, %v1276_v37  ;;  %v1226_v63 = vadd.f32 %v1129_v4, %v1037_v29  ;;  %v1048_v44 = vmul.f32 %v1548_v17, %v2447_v55  ;;  %v1549_v29 = vld [vmem:[%s1612_s15 + $0x128] sm:$0xff]  ;;  %v1042_v9 = vmul.f32 %v1550_v49, %v2445_v57  ;;  %v1551_v56 = vld [vmem:[%s1612_s15 + $0xf8] sm:$0xff] }
 0x1f8   : > { %v1273_v51 = vmax.f32 %v1219_v43, 0.0  ;;  %v1274_v35 = vmax.f32 %v1220_v42, 0.0  ;;  %v1279_v47 = vmax.f32 %v1225_v11, 0.0  ;;  %v1049_v48 = vmul.f32 %v1549_v29, %v2447_v55 }
 0x1f9   : > { %v1280_v22 = vmax.f32 %v1226_v63, 0.0  ;;  %v1124_v14 = vpop.permute.xlu1 %1123  ;;  %v1139_v2 = vpop.permute.xlu0 %1138  ;;  %v1043_v3 = vmul.f32 %v1551_v56, %v2445_v57  ;;  %v1552_v63 = vld [vmem:[%s1612_s15 + $0x140] sm:$0xff] }
 0x1fa   : > { %1327 = vst [vmem:[%s2474_s23 + $0x90] sm:$0xff] %v1273_v51  ;;  %1328 = vst.msk [vmem:[%s2474_s23 + $0x98] sm:$0xff] %vm228_vm0, %v1274_v35  ;;  %v1223_v41 = vadd.f32 %v1124_v14, %v1034_v20  ;;  %v1224_v26 = vadd.f32 %v1124_v14, %v1035_v34  ;;  %v1229_v13 = vadd.f32 %v1139_v2, %v1040_v1  ;;  %v1553_v1 = vld [vmem:[%s1612_s15 + $0x148] sm:$0xff]  ;;  %v1555_v20 = vld [vmem:[%s1612_s15 + $0x118] sm:$0xff] }
 0x1fb   : > { %1333 = vst [vmem:[%s2474_s23 + $0xc0] sm:$0xff] %v1279_v47  ;;  %1334 = vst.msk [vmem:[%s2474_s23 + $0xc8] sm:$0xff] %vm228_vm0, %v1280_v22  ;;  %v1230_v38 = vadd.f32 %v1139_v2, %v1041_v60  ;;  %v1052_v23 = vmul.f32 %v1552_v63, %v2451_v10  ;;  %v1053_v21 = vmul.f32 %v1553_v1, %v2451_v10  ;;  %v1554_v60 = vld [vmem:[%s1612_s15 + $0x110] sm:$0xff] }
 0x1fc   : > { %v1277_v27 = vmax.f32 %v1223_v41, 0.0  ;;  %v1278_v8 = vmax.f32 %v1224_v26, 0.0  ;;  %v1283_v6 = vmax.f32 %v1229_v13, 0.0  ;;  %v1046_v36 = vmul.f32 %v1554_v60, %v2449_v7  ;;  %v1556_v26 = vld [vmem:[%s1612_s15 + $0x160] sm:$0xff] }
 0x1fd   : > { %v1284_v33 = vmax.f32 %v1230_v38, 0.0  ;;  %v1134_v52 = vpop.permute.xlu1 %1133  ;;  %v1149_v12 = vpop.permute.xlu0 %1148  ;;  %v1047_v45 = vmul.f32 %v1555_v20, %v2449_v7  ;;  %v1056_v13 = vmul.f32 %v1556_v26, %v2457_v54  ;;  %v1557_v38 = vld [vmem:[%s1612_s15 + $0x168] sm:$0xff] }
 0x1fe   : > { %1331 = vst [vmem:[%s2474_s23 + $0xb0] sm:$0xff] %v1277_v27  ;;  %1332 = vst.msk [vmem:[%s2474_s23 + $0xb8] sm:$0xff] %vm228_vm0, %v1278_v8  ;;  %v1227_v31 = vadd.f32 %v1134_v52, %v1038_v61  ;;  %v1228_v24 = vadd.f32 %v1134_v52, %v1039_v40  ;;  %v1233_v16 = vadd.f32 %v1149_v12, %v1044_v58  ;;  %v1558_v58 = vld [vmem:[%s1612_s15 + $0x130] sm:$0xff] }
 0x1ff   : > { %1337 = vst [vmem:[%s2474_s23 + $0xe0] sm:$0xff] %v1283_v6  ;;  %1338 = vst.msk [vmem:[%s2474_s23 + $0xe8] sm:$0xff] %vm228_vm0, %v1284_v33  ;;  %v1234_v59 = vadd.f32 %v1149_v12, %v1045_v62  ;;  %v1057_v39 = vmul.f32 %v1557_v38, %v2457_v54  ;;  %v1050_v5 = vmul.f32 %v1558_v58, %v2453_v28  ;;  %v1559_v62 = vld [vmem:[%s1612_s15 + $0x138] sm:$0xff]  ;;  %v1560_v12 = vld [vmem:[%s1612_s15 + $0x180] sm:$0xff] }
 0x200   : > { %v1281_v30 = vmax.f32 %v1227_v31, 0.0  ;;  %v1282_v15 = vmax.f32 %v1228_v24, 0.0  ;;  %v1287_v37 = vmax.f32 %v1233_v16, 0.0  ;;  %v1051_v32 = vmul.f32 %v1559_v62, %v2453_v28  ;;  %v1561_v24 = vld [vmem:[%s1612_s15 + $0x188] sm:$0xff] }
 0x201   : > { %v1288_v50 = vmax.f32 %v1234_v59, 0.0  ;;  %v1144_v4 = vpop.permute.xlu1 %1143  ;;  %v1159_v43 = vpop.permute.xlu0 %1158  ;;  %v1060_v31 = vmul.f32 %v1560_v12, %v2461_v25  ;;  %v1061_v16 = vmul.f32 %v1561_v24, %v2461_v25  ;;  %v1562_v59 = vld [vmem:[%s1612_s15 + $0x150] sm:$0xff] }
 0x202   : > { %1335 = vst [vmem:[%s2474_s23 + $0xd0] sm:$0xff] %v1281_v30  ;;  %1336 = vst.msk [vmem:[%s2474_s23 + $0xd8] sm:$0xff] %vm228_vm0, %v1282_v15  ;;  %v1231_v55 = vadd.f32 %v1144_v4, %v1042_v9  ;;  %v1232_v42 = vadd.f32 %v1144_v4, %v1043_v3  ;;  %v1237_v11 = vadd.f32 %v1159_v43, %v1048_v44  ;;  %v1563_v44 = vld [vmem:[%s1612_s15 + $0x158] sm:$0xff] }
 0x203   : > { %1341 = vst [vmem:[%s2474_s23 + $0x100] sm:$0xff] %v1287_v37  ;;  %1342 = vst.msk [vmem:[%s2474_s23 + $0x108] sm:$0xff] %vm228_vm0, %v1288_v50  ;;  %v1238_v57 = vadd.f32 %v1159_v43, %v1049_v48  ;;  %v1054_v17 = vmul.f32 %v1562_v59, %v2455_v18  ;;  %v1055_v29 = vmul.f32 %v1563_v44, %v2455_v18  ;;  %v1564_v50 = vld [vmem:[%s1612_s15 + $0x1a0] sm:$0xff]  ;;  %v1565_v43 = vld [vmem:[%s1612_s15 + $0x1a8] sm:$0xff] }
 0x204   : > { %v1285_v34 = vmax.f32 %v1231_v55, 0.0  ;;  %v1286_v51 = vmax.f32 %v1232_v42, 0.0  ;;  %v1291_v35 = vmax.f32 %v1237_v11, 0.0  ;;  %v1064_v4 = vmul.f32 %v1564_v50, %v2467_v53  ;;  %v1566_v42 = vld [vmem:[%s1612_s15 + $0x170] sm:$0xff] }
 0x205   : > { %v1292_v47 = vmax.f32 %v1238_v57, 0.0  ;;  %v1154_v22 = vpop.permute.xlu1 %1153  ;;  %v1169_v14 = vpop.permute.xlu0 %1168  ;;  %v1065_v55 = vmul.f32 %v1565_v43, %v2467_v53  ;;  %v1058_v11 = vmul.f32 %v1566_v42, %v2459_v46  ;;  %v1567_v57 = vld [vmem:[%s1612_s15 + $0x178] sm:$0xff] }
 0x206   : > { %1339 = vst [vmem:[%s2474_s23 + $0xf0] sm:$0xff] %v1285_v34  ;;  %1340 = vst.msk [vmem:[%s2474_s23 + $0xf8] sm:$0xff] %vm228_vm0, %v1286_v51  ;;  %v1235_v10 = vadd.f32 %v1154_v22, %v1046_v36  ;;  %v1236_v2 = vadd.f32 %v1154_v22, %v1047_v45  ;;  %v1241_v41 = vadd.f32 %v1169_v14, %v1052_v23  ;;  %v1568_v51 = vld [vmem:[%s1612_s15 + $0x190] sm:$0xff] }
 0x207   : > { %1345 = vst [vmem:[%s2474_s23 + $0x120] sm:$0xff] %v1291_v35  ;;  %1346 = vst.msk [vmem:[%s2474_s23 + $0x128] sm:$0xff] %vm228_vm0, %v1292_v47  ;;  %v1242_v7 = vadd.f32 %v1169_v14, %v1053_v21  ;;  %v1059_v63 = vmul.f32 %v1567_v57, %v2459_v46  ;;  %v1062_v35 = vmul.f32 %v1568_v51, %v2463_v0  ;;  %v1569_v47 = vld [vmem:[%s1612_s15 + $0x198] sm:$0xff] }
 0x208   : > { %v1289_v61 = vmax.f32 %v1235_v10, 0.0  ;;  %v1290_v19 = vmax.f32 %v1236_v2, 0.0  ;;  %v1295_v40 = vmax.f32 %v1241_v41, 0.0  ;;  %v1063_v22 = vmul.f32 %v1569_v47, %v2463_v0 }
 0x209   : > { %v1296_v27 = vmax.f32 %v1242_v7, 0.0  ;;  %v1164_v8 = vpop.permute.xlu1 %1163  ;;  %v1179_v6 = vpop.permute.xlu0 %1178 }
 0x20a   : > { %1343 = vst [vmem:[%s2474_s23 + $0x110] sm:$0xff] %v1289_v61  ;;  %1344 = vst.msk [vmem:[%s2474_s23 + $0x118] sm:$0xff] %vm228_vm0, %v1290_v19  ;;  %v1239_v54 = vadd.f32 %v1164_v8, %v1050_v5  ;;  %v1240_v33 = vadd.f32 %v1164_v8, %v1051_v32  ;;  %v1245_v52 = vadd.f32 %v1179_v6, %v1056_v13 }
 0x20b   : > { %1349 = vst [vmem:[%s2474_s23 + $0x140] sm:$0xff] %v1295_v40  ;;  %1350 = vst.msk [vmem:[%s2474_s23 + $0x148] sm:$0xff] %vm228_vm0, %v1296_v27  ;;  %v1246_v28 = vadd.f32 %v1179_v6, %v1057_v39 }
 0x20c   : > { %v1293_v48 = vmax.f32 %v1239_v54, 0.0  ;;  %v1294_v49 = vmax.f32 %v1240_v33, 0.0  ;;  %v1299_v9 = vmax.f32 %v1245_v52, 0.0 }
 0x20d   : > { %v1300_v56 = vmax.f32 %v1246_v28, 0.0  ;;  %v1174_v3 = vpop.permute.xlu1 %1173  ;;  %v1189_v30 = vpop.permute.xlu0 %1188 }
 0x20e   : > { %1347 = vst [vmem:[%s2474_s23 + $0x130] sm:$0xff] %v1293_v48  ;;  %1348 = vst.msk [vmem:[%s2474_s23 + $0x138] sm:$0xff] %vm228_vm0, %v1294_v49  ;;  %v1243_v25 = vadd.f32 %v1174_v3, %v1054_v17  ;;  %v1244_v15 = vadd.f32 %v1174_v3, %v1055_v29  ;;  %v1249_v37 = vadd.f32 %v1189_v30, %v1060_v31 }
 0x20f   : > { %1353 = vst [vmem:[%s2474_s23 + $0x160] sm:$0xff] %v1299_v9  ;;  %1354 = vst.msk [vmem:[%s2474_s23 + $0x168] sm:$0xff] %vm228_vm0, %v1300_v56  ;;  %v1250_v18 = vadd.f32 %v1189_v30, %v1061_v16 }
 0x210   : > { %v1297_v23 = vmax.f32 %v1243_v25, 0.0  ;;  %v1298_v1 = vmax.f32 %v1244_v15, 0.0  ;;  %v1303_v21 = vmax.f32 %v1249_v37, 0.0 }
 0x211   : > { %v1304_v60 = vmax.f32 %v1250_v18, 0.0  ;;  %v1184_v36 = vpop.permute.xlu1 %1183  ;;  %v1199_v20 = vpop.permute.xlu0 %1198 }
 0x212   : > { %1351 = vst [vmem:[%s2474_s23 + $0x150] sm:$0xff] %v1297_v23  ;;  %1352 = vst.msk [vmem:[%s2474_s23 + $0x158] sm:$0xff] %vm228_vm0, %v1298_v1  ;;  %v1247_v53 = vadd.f32 %v1184_v36, %v1058_v11  ;;  %v1248_v45 = vadd.f32 %v1184_v36, %v1059_v63  ;;  %v1253_v46 = vadd.f32 %v1199_v20, %v1064_v4 }
 0x213   : > { %1357 = vst [vmem:[%s2474_s23 + $0x180] sm:$0xff] %v1303_v21  ;;  %1358 = vst.msk [vmem:[%s2474_s23 + $0x188] sm:$0xff] %vm228_vm0, %v1304_v60  ;;  %v1254_v34 = vadd.f32 %v1199_v20, %v1065_v55 }
 0x214   : > { %v1301_v14 = vmax.f32 %v1247_v53, 0.0  ;;  %v1302_v10 = vmax.f32 %v1248_v45, 0.0  ;;  %v1307_v2 = vmax.f32 %v1253_v46, 0.0 }
 0x215   : > { %v1308_v41 = vmax.f32 %v1254_v34, 0.0  ;;  %v1194_v7 = vpop.permute.xlu1 %1193 }
 0x216   : > { %1355 = vst [vmem:[%s2474_s23 + $0x170] sm:$0xff] %v1301_v14  ;;  %1356 = vst.msk [vmem:[%s2474_s23 + $0x178] sm:$0xff] %vm228_vm0, %v1302_v10  ;;  %v1251_v26 = vadd.f32 %v1194_v7, %v1062_v35  ;;  %v1252_v13 = vadd.f32 %v1194_v7, %v1063_v22 }
 0x217   : > { %1361 = vst [vmem:[%s2474_s23 + $0x1a0] sm:$0xff] %v1307_v2  ;;  %1362 = vst.msk [vmem:[%s2474_s23 + $0x1a8] sm:$0xff] %vm228_vm0, %v1308_v41 }
 0x218   : > { %v1305_v38 = vmax.f32 %v1251_v26, 0.0  ;;  %v1306_v39 = vmax.f32 %v1252_v13, 0.0 }
 0x21a   : > { %1359 = vst [vmem:[%s2474_s23 + $0x190] sm:$0xff] %v1305_v38  ;;  %1360 = vst.msk [vmem:[%s2474_s23 + $0x198] sm:$0xff] %vm228_vm0, %v1306_v39 }
 0x21b PF: > { %s12_s9 = sadd.s32 1, %s1576_s9  }
 0x21c   : > { %p9_p4 = scmp.ge.s32.totalorder %s12_s9, 6  }
 0x21e   :  { %11 = sbr.rel (!%p9_p4) target bundleno = 1 (0x1), region = 61 }

</bundles_post_ra>
